<compile_context>
chip_gen: v6e
topology: v6e:2x2x1
jax: 0.10.0
libtpu: 0.0.40
codegen_flags: <defaults>
</compile_context>

<pallas_src>
import functools

import jax
import jax.numpy as jnp
from jax import lax
from jax.experimental import pallas as pl
from jax.experimental.pallas import tpu as pltpu

LN_EPS = 1e-5                                  # PyTorch nn.LayerNorm default
VMEM_LIMIT_BYTES = 40 * 1024 * 1024            # v7x-safe; raise on v5e/v6e after a sweep


def _round_up(v, m):
    return ((v + m - 1) // m) * m


def _pick_tile(n_pad, candidates):
    for c in candidates:
        if c <= n_pad and n_pad % c == 0:
            return c
    return n_pad


def _masked_layernorm(h, gamma, beta, d_real):
    """LayerNorm over the first `d_real` lanes of `h` (pad lanes of h are zero)."""
    d_pad = h.shape[-1]
    if d_real == d_pad:
        mean = jnp.mean(h, axis=-1, keepdims=True)
        diff = h - mean
        var = jnp.mean(diff * diff, axis=-1, keepdims=True)
    else:
        lane = lax.broadcasted_iota(jnp.int32, (1, d_pad), 1)
        mask = lane < d_real
        inv_d = 1.0 / float(d_real)
        mean = jnp.sum(h, axis=-1, keepdims=True) * inv_d
        diff = jnp.where(mask, h - mean, 0.0)
        var = jnp.sum(diff * diff, axis=-1, keepdims=True) * inv_d
    return diff * lax.rsqrt(var + LN_EPS) * gamma + beta


# --------------------------------------------------------------------------
# Kernel A: layer 0 (or the single layer when num_layers == 1).
# grid = (row_tile, k_tile); aggregates (I+A) @ X with per-stage padded widths.
# --------------------------------------------------------------------------
def gin_first_layer_kernel(adj_ref, x_ref, w1_ref, b1_ref, g1_ref, be1_ref,
                           w2_ref, b2_ref, g2_ref, be2_ref,
                           out_ref, acc_ref,
                           *, tm, hidden_real, apply_node_func):
    k = pl.program_id(1)
    nk = pl.num_programs(1)

    @pl.when(k == 0)
    def _():
        acc_ref[...] = jnp.zeros_like(acc_ref)

    acc_ref[...] += jnp.dot(adj_ref[...], x_ref[...],
                            preferred_element_type=jnp.float32)

    @pl.when(k == nk - 1)
    def _():
        rc = min(tm, 128)                       # sub-tiled epilogue (vreg pressure)

        def chunk(r, carry):
            row = pl.multiple_of(r * rc, rc)
            agg = acc_ref[pl.ds(row, rc), :].astype(jnp.bfloat16)
            h = jnp.dot(agg, w1_ref[...],
                        preferred_element_type=jnp.float32) + b1_ref[...]
            h = jnp.maximum(
                _masked_layernorm(h, g1_ref[...], be1_ref[...], hidden_real), 0.0)
            h = jnp.dot(h.astype(jnp.bfloat16), w2_ref[...],
                        preferred_element_type=jnp.float32) + b2_ref[...]
            if apply_node_func:                 # static: layer 0 of a deeper GIN
                h = jnp.maximum(
                    _masked_layernorm(h, g2_ref[...], be2_ref[...], hidden_real), 0.0)
            out_ref[pl.ds(row, rc), :] = h.astype(out_ref.dtype)
            return carry

        lax.fori_loop(0, tm // rc, chunk, 0, unroll=True)


# --------------------------------------------------------------------------
# Kernel B: layers 1..L-1 fused.  grid = (layer, row_tile, k_tile).
# Layer-0 activations are streamed once (seeded into VMEM ping/pong scratch);
# all layers aggregate with one matmul path from that scratch.
# --------------------------------------------------------------------------
def gin_rest_kernel(adj_ref, h0_ref, w1_ref, b1_ref, g1_ref, be1_ref,
                    w2_ref, b2_ref, g2_ref, be2_ref,
                    hid_ref, out_ref, acc_ref, hbuf,
                    *, tm, tk, n_pad, dh_pad, hidden_real, num_inner):
    l = pl.program_id(0)
    i = pl.program_id(1)
    k = pl.program_id(2)
    nk = pl.num_programs(2)
    k_start = pl.multiple_of(k * tk, tk)

    # Seed ping buffer (rows [0, n_pad)) with layer-0 activations, streamed once.
    @pl.when(jnp.logical_and(l == 0, i == 0))
    def _():
        hbuf[pl.ds(k_start, tk), :] = h0_ref[...]

    @pl.when(k == 0)
    def _():
        acc_ref[...] = jnp.zeros_like(acc_ref)

    # Single aggregation path: read slot = l % 2 of the ping/pong scratch.
    slot_read = l % 2
    src_off = pl.multiple_of(slot_read * n_pad + k_start, tk)
    acc_ref[...] += jnp.dot(adj_ref[...], hbuf[pl.ds(src_off, tk), :],
                            preferred_element_type=jnp.float32)

    @pl.when(k == nk - 1)
    def _():
        rc = min(tm, 128)
        slot_write = 1 - slot_read
        i_start = pl.multiple_of(i * tm, tm)
        is_last = l == num_inner - 1

        def chunk(r, carry):
            row = pl.multiple_of(r * rc, rc)
            agg = acc_ref[pl.ds(row, rc), :].astype(jnp.bfloat16)
            h = jnp.dot(agg, w1_ref[0],
                        preferred_element_type=jnp.float32) + b1_ref[0]
            h = jnp.maximum(
                _masked_layernorm(h, g1_ref[0], be1_ref[0], hidden_real), 0.0)
            h = jnp.dot(h.astype(jnp.bfloat16), w2_ref[0],
                        preferred_element_type=jnp.float32) + b2_ref[0]

            @pl.when(is_last)                   # final layer: plain MLP output (f32)
            def _():
                out_ref[pl.ds(row, rc), :] = h.astype(out_ref.dtype)

            @pl.when(jnp.logical_not(is_last))  # ApplyNodeFunc: LN -> ReLU
            def _():
                h_nl = jnp.maximum(
                    _masked_layernorm(h, g2_ref[0], be2_ref[0], hidden_real), 0.0)
                h_bf = h_nl[:, :dh_pad].astype(jnp.bfloat16)
                hid_ref[0, pl.ds(row, rc), :] = h_bf
                dst_off = pl.multiple_of(slot_write * n_pad + i_start + row, rc)
                hbuf[pl.ds(dst_off, rc), :] = h_bf
            return carry

        lax.fori_loop(0, tm // rc, chunk, 0, unroll=True)


# --------------------------------------------------------------------------
# Wrapper
# --------------------------------------------------------------------------
def gin_forward(x, edge_index, layer_params, return_hidden=False):
    """GIN.forward. x: [N, in_dim] f32, edge_index: [2, E] int32 (row0=src, row1=dst)."""
    n, in_dim = x.shape
    num_layers = len(layer_params)
    hidden = layer_params[0]["w1"].shape[1]
    out_dim = layer_params[-1]["w2"].shape[1]

    # Per-stage lane-dense padded widths.
    in_pad = _round_up(max(in_dim, 128), 128)
    dh_pad = _round_up(max(hidden, 128), 128)
    out_pad = _round_up(max(out_dim, 128), 128)

    n_pad = _round_up(max(n, 128), 128)
    tm = _pick_tile(n_pad, (256, 128))
    tk = _pick_tile(n_pad, (512, 256, 128))

    def padw(w, r, c):
        return jnp.pad(w, ((0, r - w.shape[0]), (0, c - w.shape[1])))

    def padv(v, c):
        return jnp.pad(v, ((0, 0), (0, c - v.shape[1])))

    # Dense message-passing operator (I + A), A[dst, src] = edge multiplicity.
    adj = jnp.zeros((n, n), jnp.float32).at[edge_index[1], edge_index[0]].add(1.0)
    adj = adj + jnp.eye(n, dtype=jnp.float32)
    adj_p = jnp.pad(adj, ((0, n_pad - n), (0, n_pad - n))).astype(jnp.bfloat16)

    x_p = jnp.pad(x.astype(jnp.float32),
                  ((0, n_pad - n), (0, in_pad - in_dim))).astype(jnp.bfloat16)

    # ----- layer 0 -----
    p0 = layer_params[0]
    do_a_pad = dh_pad if num_layers > 1 else out_pad
    out0_dtype = jnp.bfloat16 if num_layers > 1 else jnp.float32

    w1_0 = padw(p0["w1"], in_pad, dh_pad).astype(jnp.bfloat16)
    b1_0 = padv(p0["b1"], dh_pad)
    g1_0 = padv(p0["g1"], dh_pad)
    be1_0 = padv(p0["be1"], dh_pad)
    w2_0 = padw(p0["w2"], dh_pad, do_a_pad).astype(jnp.bfloat16)
    b2_0 = padv(p0["b2"], do_a_pad)
    g2_0 = padv(p0["g2"], do_a_pad)
    be2_0 = padv(p0["be2"], do_a_pad)

    first_kernel = functools.partial(
        gin_first_layer_kernel, tm=tm, hidden_real=hidden,
        apply_node_func=(num_layers > 1))

    cvec_a = pl.BlockSpec((1, dh_pad), lambda i, k: (0, 0))
    cvec_b = pl.BlockSpec((1, do_a_pad), lambda i, k: (0, 0))

    h0 = pl.pallas_call(
        first_kernel,
        out_shape=jax.ShapeDtypeStruct((n_pad, do_a_pad), out0_dtype),
        grid_spec=pltpu.PrefetchScalarGridSpec(
            num_scalar_prefetch=0,
            grid=(n_pad // tm, n_pad // tk),
            in_specs=[
                pl.BlockSpec((tm, tk), lambda i, k: (i, k)),        # (I+A) panels
                pl.BlockSpec((tk, in_pad), lambda i, k: (k, 0)),    # node features
                pl.BlockSpec((in_pad, dh_pad), lambda i, k: (0, 0)),
                cvec_a, cvec_a, cvec_a,
                pl.BlockSpec((dh_pad, do_a_pad), lambda i, k: (0, 0)),
                cvec_b, cvec_b, cvec_b,
            ],
            out_specs=pl.BlockSpec((tm, do_a_pad), lambda i, k: (i, 0)),
            scratch_shapes=[pltpu.VMEM((tm, in_pad), jnp.float32)],
        ),
        compiler_params=pltpu.CompilerParams(
            dimension_semantics=("parallel", "arbitrary"),
            vmem_limit_bytes=VMEM_LIMIT_BYTES,
        ),
    )(adj_p, x_p, w1_0, b1_0, g1_0, be1_0, w2_0, b2_0, g2_0, be2_0)

    if num_layers == 1:
        out = h0[:n, :out_dim]
        if return_hidden:
            return out, [out]
        return out

    # ----- layers 1..L-1, fused -----
    num_inner = num_layers - 1
    wo_pad = max(dh_pad, out_pad)

    # VMEM budget sanity (v7x 64 MiB physical; hbuf is the N-capping term).
    scratch_bytes = tm * dh_pad * 4 + 2 * n_pad * dh_pad * 2
    block_bytes = 2 * (tm * tk * 2 + tk * dh_pad * 2
                       + dh_pad * dh_pad * 2 + dh_pad * wo_pad * 2
                       + 4 * dh_pad * 4 + 4 * wo_pad * 4
                       + tm * dh_pad * 2 + tm * wo_pad * 4)
    if scratch_bytes + block_bytes > VMEM_LIMIT_BYTES:
        raise ValueError(
            f"Fused GIN working set ({scratch_bytes + block_bytes} B) exceeds the "
            f"VMEM budget ({VMEM_LIMIT_BYTES} B); reduce graph size or tiles. "
            "TODO(synk): CSR scalar-prefetch path removes this limit.")

    rest = layer_params[1:]
    w1s = jnp.stack([padw(p["w1"], dh_pad, dh_pad) for p in rest]).astype(jnp.bfloat16)
    b1s = jnp.stack([padv(p["b1"], dh_pad) for p in rest])
    g1s = jnp.stack([padv(p["g1"], dh_pad) for p in rest])
    be1s = jnp.stack([padv(p["be1"], dh_pad) for p in rest])
    w2s = jnp.stack([padw(p["w2"], dh_pad, wo_pad) for p in rest]).astype(jnp.bfloat16)
    b2s = jnp.stack([padv(p["b2"], wo_pad) for p in rest])
    g2s = jnp.stack([padv(p["g2"], wo_pad) for p in rest])
    be2s = jnp.stack([padv(p["be2"], wo_pad) for p in rest])

    rest_kernel = functools.partial(
        gin_rest_kernel, tm=tm, tk=tk, n_pad=n_pad, dh_pad=dh_pad,
        hidden_real=hidden, num_inner=num_inner)

    wspec1 = pl.BlockSpec((1, dh_pad, dh_pad), lambda l, i, k: (l, 0, 0))
    vspec1 = pl.BlockSpec((1, 1, dh_pad), lambda l, i, k: (l, 0, 0))
    wspec2 = pl.BlockSpec((1, dh_pad, wo_pad), lambda l, i, k: (l, 0, 0))
    vspec2 = pl.BlockSpec((1, 1, wo_pad), lambda l, i, k: (l, 0, 0))

    def h0_map(l, i, k):
        # Stream layer-0 activations only during (l==0, i==0); pinned afterwards
        # so they are never re-DMA'd for deeper layers / other row tiles.
        first = jnp.logical_and(l == 0, i == 0).astype(jnp.int32)
        return (k * first, 0)

    hid_stacked, final = pl.pallas_call(
        rest_kernel,
        out_shape=(
            jax.ShapeDtypeStruct((num_inner, n_pad, dh_pad), jnp.bfloat16),
            jax.ShapeDtypeStruct((n_pad, wo_pad), jnp.float32),
        ),
        grid_spec=pltpu.PrefetchScalarGridSpec(
            num_scalar_prefetch=0,
            grid=(num_inner, n_pad // tm, n_pad // tk),
            in_specs=[
                pl.BlockSpec((tm, tk), lambda l, i, k: (i, k)),   # (I+A) panels
                pl.BlockSpec((tk, dh_pad), h0_map),               # layer-0 activations
                wspec1, vspec1, vspec1, vspec1,                   # w1, b1, ln1 gamma/beta
                wspec2, vspec2, vspec2, vspec2,                   # w2, b2, ln2 gamma/beta
            ],
            out_specs=(
                pl.BlockSpec((1, tm, dh_pad), lambda l, i, k: (l, i, 0)),
                pl.BlockSpec((tm, wo_pad), lambda l, i, k: (i, 0)),
            ),
            scratch_shapes=[
                pltpu.VMEM((tm, dh_pad), jnp.float32),            # aggregation accumulator
                pltpu.VMEM((2 * n_pad, dh_pad), jnp.bfloat16),    # activation ping/pong
            ],
        ),
        compiler_params=pltpu.CompilerParams(
            # All axes sequential on purpose: deeper layers read the previous
            # layer's activations from the per-core VMEM scratch.
            dimension_semantics=("arbitrary", "arbitrary", "arbitrary"),
            vmem_limit_bytes=VMEM_LIMIT_BYTES,
        ),
    )(adj_p, h0, w1s, b1s, g1s, be1s, w2s, b2s, g2s, be2s)

    out = final[:n, :out_dim]
    if return_hidden:
        hidden_list = [h0[:n, :hidden].astype(jnp.float32)]
        for l in range(1, num_layers - 1):
            hidden_list.append(hid_stacked[l - 1, :n, :hidden].astype(jnp.float32))
        hidden_list.append(out)
        return out, hidden_list          # head = nn.Identity()
    return out


# --------------------------------------------------------------------------
# Pure-JAX reference mirroring the kernel's bf16 streaming / bf16 MXU epilogue.
# --------------------------------------------------------------------------
def gin_reference(x, edge_index, layer_params):
    n = x.shape[0]
    hp = lax.Precision.HIGHEST
    bf = lambda a: a.astype(jnp.bfloat16).astype(jnp.float32)
    adj = jnp.zeros((n, n), jnp.float32).at[edge_index[1], edge_index[0]].add(1.0)
    op = bf(adj + jnp.eye(n, dtype=jnp.float32))
    num_layers = len(layer_params)
    h = x
    hidden_list = []
    for l, p in enumerate(layer_params):
        agg = jnp.dot(op, bf(h), precision=hp)
        z = jnp.dot(bf(agg), bf(p["w1"]), precision=hp) + p["b1"]
        mean = jnp.mean(z, axis=-1, keepdims=True)
        var = jnp.mean((z - mean) ** 2, axis=-1, keepdims=True)
        z = (z - mean) * lax.rsqrt(var + LN_EPS) * p["g1"] + p["be1"]
        z = jnp.maximum(z, 0.0)
        z = jnp.dot(bf(z), bf(p["w2"]), precision=hp) + p["b2"]
        if l < num_layers - 1:
            mean = jnp.mean(z, axis=-1, keepdims=True)
            var = jnp.mean((z - mean) ** 2, axis=-1, keepdims=True)
            z = (z - mean) * lax.rsqrt(var + LN_EPS) * p["g2"] + p["be2"]
            z = jnp.maximum(z, 0.0)
        h = z
        hidden_list.append(h)
    return h, hidden_list


def init_gin_params(key, in_dim, num_hidden, out_dim, num_layers):
    """Deterministic synthetic parameters matching the module's shapes."""
    params = []
    d_in = in_dim
    for l in range(num_layers):
        d_out = num_hidden if l < num_layers - 1 else out_dim
        key, k1, k2 = jax.random.split(key, 3)
        w1 = jax.random.normal(k1, (d_in, num_hidden), jnp.float32) / jnp.sqrt(float(d_in))
        b1 = jnp.zeros((1, num_hidden), jnp.float32)
        g1 = jnp.ones((1, num_hidden), jnp.float32)     # MLP LayerNorm weight
        be1 = jnp.zeros((1, num_hidden), jnp.float32)   # MLP LayerNorm bias
        w2 = jax.random.normal(k2, (num_hidden, d_out), jnp.float32) / jnp.sqrt(float(num_hidden))
        b2 = jnp.zeros((1, d_out), jnp.float32)
        g2 = jnp.ones((1, d_out), jnp.float32)           # ApplyNodeFunc LayerNorm weight
        be2 = jnp.zeros((1, d_out), jnp.float32)         # ApplyNodeFunc LayerNorm bias
        params.append(dict(w1=w1, b1=b1, g1=g1, be1=be1,
                           w2=w2, b2=b2, g2=g2, be2=be2))
        d_in = d_out
    return params


if __name__ == "__main__":
    # Small graph: 64 nodes, 16 input features, hidden 32, out 48, 3 GIN layers, 256 edges.
    N, IN_DIM, HIDDEN, OUT_DIM, NUM_LAYERS, E = 64, 16, 32, 48, 3, 256

    key = jax.random.PRNGKey(0)
    key, kx, ke, kp = jax.random.split(key, 4)
    x = jax.random.normal(kx, (N, IN_DIM), jnp.float32)
    edge_index = jax.random.randint(ke, (2, E), 0, N, dtype=jnp.int32)

    # --- multi-layer GIN (exercises layer-0 kernel + fused ping/pong kernel) ---
    params = init_gin_params(kp, IN_DIM, HIDDEN, OUT_DIM, NUM_LAYERS)
    out, hidden = gin_forward(x, edge_index, params, return_hidden=True)
    out = jax.block_until_ready(out)
    assert out.shape == (N, OUT_DIM) and out.dtype == jnp.float32
    assert len(hidden) == NUM_LAYERS and hidden[0].shape == (N, HIDDEN)

    ref_out, ref_hidden = gin_reference(x, edge_index, params)
    ok = bool(jnp.allclose(out, ref_out, atol=5e-2, rtol=5e-2))
    for l in range(NUM_LAYERS):
        ok = ok and bool(jnp.allclose(hidden[l], ref_hidden[l], atol=5e-2, rtol=5e-2))
    if not ok:
        raise AssertionError("Pallas GIN (multi-layer) mismatch vs pure-JAX reference")

    # --- single-layer GIN (plain 2-layer MLP apply_func, no ApplyNodeFunc) ---
    params1 = init_gin_params(kp, IN_DIM, HIDDEN, OUT_DIM, 1)
    out1 = jax.block_until_ready(gin_forward(x, edge_index, params1))
    ref1, _ = gin_reference(x, edge_index, params1)
    if not bool(jnp.allclose(out1, ref1, atol=5e-2, rtol=5e-2)):
        raise AssertionError("Pallas GIN (single-layer) mismatch vs pure-JAX reference")

    print("KERNEL_OK")
</pallas_src>

<mosaic_0001>
module attributes {stable_mosaic.version = 11 : i64} {
  func.func @gin_first_layer_kernel(%arg0: i32, %arg1: i32, %arg2: memref<128x128xbf16, #tpu.memory_space<vmem>>, %arg3: memref<128x128xbf16, #tpu.memory_space<vmem>>, %arg4: memref<128x128xbf16, #tpu.memory_space<vmem>>, %arg5: memref<1x128xf32, #tpu.memory_space<vmem>>, %arg6: memref<1x128xf32, #tpu.memory_space<vmem>>, %arg7: memref<1x128xf32, #tpu.memory_space<vmem>>, %arg8: memref<128x128xbf16, #tpu.memory_space<vmem>>, %arg9: memref<1x128xf32, #tpu.memory_space<vmem>>, %arg10: memref<1x128xf32, #tpu.memory_space<vmem>>, %arg11: memref<1x128xf32, #tpu.memory_space<vmem>>, %arg12: memref<128x128xbf16, #tpu.memory_space<vmem>>, %arg13: memref<128x128xf32, #tpu.memory_space<vmem>>) attributes {dimension_semantics = [#tpu.dimension_semantics<parallel>, #tpu.dimension_semantics<arbitrary>], iteration_bounds = array<i64: 1, 1>, scalar_prefetch = 0 : i64, scratch_operands = 1 : i64, tpu.core_type = #tpu.core_type<tc>, window_params = [{transform_indices = @transform_0, window_bounds = array<i64: 128, 128>}, {transform_indices = @transform_1, window_bounds = array<i64: 128, 128>}, {pipeline_mode = #tpu.pipeline_mode<synchronous>, transform_indices = @transform_2, window_bounds = array<i64: 128, 128>}, {pipeline_mode = #tpu.pipeline_mode<synchronous>, transform_indices = @transform_3, window_bounds = array<i64: 1, 128>}, {pipeline_mode = #tpu.pipeline_mode<synchronous>, transform_indices = @transform_4, window_bounds = array<i64: 1, 128>}, {pipeline_mode = #tpu.pipeline_mode<synchronous>, transform_indices = @transform_5, window_bounds = array<i64: 1, 128>}, {pipeline_mode = #tpu.pipeline_mode<synchronous>, transform_indices = @transform_6, window_bounds = array<i64: 128, 128>}, {pipeline_mode = #tpu.pipeline_mode<synchronous>, transform_indices = @transform_7, window_bounds = array<i64: 1, 128>}, {pipeline_mode = #tpu.pipeline_mode<synchronous>, transform_indices = @transform_8, window_bounds = array<i64: 1, 128>}, {pipeline_mode = #tpu.pipeline_mode<synchronous>, transform_indices = @transform_9, window_bounds = array<i64: 1, 128>}, {transform_indices = @transform_10, window_bounds = array<i64: 128, 128>}]} {
    %c0_i32 = arith.constant 0 : i32
    %0 = arith.cmpi eq, %arg1, %c0_i32 : i32
    %1 = arith.extui %0 : i1 to i32
    %c0_i32_0 = arith.constant 0 : i32
    %2 = arith.cmpi ne, %1, %c0_i32_0 : i32
    scf.if %2 {
      %cst_10 = arith.constant 0.000000e+00 : f32
      %12 = vector.broadcast %cst_10 : f32 to vector<128x128xf32>
      %c0_11 = arith.constant 0 : index
      %c0_12 = arith.constant 0 : index
      %13 = vector.load %arg13[%c0_11, %c0_12] : memref<128x128xf32, #tpu.memory_space<vmem>>, vector<128x128xf32>
      tpu.vector_store %arg13[%c0_11, %c0_12], %12 {strides = array<i32>} : memref<128x128xf32, #tpu.memory_space<vmem>>, vector<128x128xf32>,
    } else {
    }
    %c0 = arith.constant 0 : index
    %c0_1 = arith.constant 0 : index
    %3 = vector.load %arg13[%c0, %c0_1] : memref<128x128xf32, #tpu.memory_space<vmem>>, vector<128x128xf32>
    %c0_2 = arith.constant 0 : index
    %c0_3 = arith.constant 0 : index
    %4 = vector.load %arg2[%c0_2, %c0_3] : memref<128x128xbf16, #tpu.memory_space<vmem>>, vector<128x128xbf16>
    %c0_4 = arith.constant 0 : index
    %c0_5 = arith.constant 0 : index
    %5 = vector.load %arg3[%c0_4, %c0_5] : memref<128x128xbf16, #tpu.memory_space<vmem>>, vector<128x128xbf16>
    %cst = arith.constant dense<0.000000e+00> : vector<128x128xf32>
    %6 = tpu.matmul %4, %5, %cst {dimension_numbers = #tpu.dot_dimension_numbers<[1], [0], [0], [1], [0, 0, 1, 1], [], []>} : vector<128x128xbf16>, vector<128x128xbf16>, vector<128x128xf32> -> vector<128x128xf32>
    %7 = arith.addf %3, %6 : vector<128x128xf32>
    %c0_6 = arith.constant 0 : index
    %c0_7 = arith.constant 0 : index
    %8 = vector.load %arg13[%c0_6, %c0_7] : memref<128x128xf32, #tpu.memory_space<vmem>>, vector<128x128xf32>
    tpu.vector_store %arg13[%c0_6, %c0_7], %7 {strides = array<i32>} : memref<128x128xf32, #tpu.memory_space<vmem>>, vector<128x128xf32>,
    %c0_i32_8 = arith.constant 0 : i32
    %9 = arith.cmpi eq, %arg1, %c0_i32_8 : i32
    %10 = arith.extui %9 : i1 to i32
    %c0_i32_9 = arith.constant 0 : i32
    %11 = arith.cmpi ne, %10, %c0_i32_9 : i32
    scf.if %11 {
      %c0_i32_10 = arith.constant 0 : i32
      %c128_i32 = arith.constant 128 : i32
      %12 = arith.muli %c0_i32_10, %c128_i32 : i32
      %13 = tpu.assume_multiple %12, 128 : i32
      %14 = arith.index_cast %13 : i32 to index
      %c0_11 = arith.constant 0 : index
      %15 = vector.load %arg13[%14, %c0_11] : memref<128x128xf32, #tpu.memory_space<vmem>>, vector<128x128xf32>
      %16 = arith.truncf %15 : vector<128x128xf32> to vector<128x128xbf16>
      %c0_12 = arith.constant 0 : index
      %c0_13 = arith.constant 0 : index
      %17 = vector.load %arg4[%c0_12, %c0_13] : memref<128x128xbf16, #tpu.memory_space<vmem>>, vector<128x128xbf16>
      %cst_14 = arith.constant dense<0.000000e+00> : vector<128x128xf32>
      %18 = tpu.matmul %16, %17, %cst_14 {dimension_numbers = #tpu.dot_dimension_numbers<[1], [0], [0], [1], [0, 0, 1, 1], [], []>} : vector<128x128xbf16>, vector<128x128xbf16>, vector<128x128xf32> -> vector<128x128xf32>
      %c0_15 = arith.constant 0 : index
      %c0_16 = arith.constant 0 : index
      %19 = vector.load %arg5[%c0_15, %c0_16] : memref<1x128xf32, #tpu.memory_space<vmem>>, vector<1x128xf32>
      %20 = vector.broadcast %19 : vector<1x128xf32> to vector<128x128xf32>
      %21 = arith.addf %18, %20 : vector<128x128xf32>
      %c0_17 = arith.constant 0 : index
      %c0_18 = arith.constant 0 : index
      %22 = vector.load %arg6[%c0_17, %c0_18] : memref<1x128xf32, #tpu.memory_space<vmem>>, vector<1x128xf32>
      %c0_19 = arith.constant 0 : index
      %c0_20 = arith.constant 0 : index
      %23 = vector.load %arg7[%c0_19, %c0_20] : memref<1x128xf32, #tpu.memory_space<vmem>>, vector<1x128xf32>
      %24 = tpu.iota {dimensions = array<i32: 1>} : vector<1x128xi32>
      %c32_i32 = arith.constant 32 : i32
      %25 = vector.broadcast %c32_i32 : i32 to vector<1x128xi32>
      %26 = arith.cmpi slt, %24, %25 : vector<1x128xi32>
      %cst_21 = arith.constant dense<0.000000e+00> : vector<128xf32>
      %27 = vector.multi_reduction <add>, %21, %cst_21 [1] : vector<128x128xf32> to vector<128xf32>
      %28 = vector.shape_cast %27 : vector<128xf32> to vector<128x1xf32>
      %cst_22 = arith.constant 3.125000e-02 : f32
      %29 = vector.broadcast %cst_22 : f32 to vector<128x1xf32>
      %30 = arith.mulf %28, %29 : vector<128x1xf32>
      %31 = vector.broadcast %30 : vector<128x1xf32> to vector<128x128xf32>
      %32 = arith.subf %21, %31 : vector<128x128xf32>
      %cst_23 = arith.constant 0.000000e+00 : f32
      %33 = vector.shape_cast %26 : vector<1x128xi1> to vector<1x128xi1>
      %34 = vector.broadcast %33 : vector<1x128xi1> to vector<128x128xi1>
      %35 = vector.broadcast %cst_23 : f32 to vector<128x128xf32>
      %36 = arith.select %34, %32, %35 : vector<128x128xi1>, vector<128x128xf32>
      %37 = arith.mulf %36, %36 : vector<128x128xf32>
      %cst_24 = arith.constant dense<0.000000e+00> : vector<128xf32>
      %38 = vector.multi_reduction <add>, %37, %cst_24 [1] : vector<128x128xf32> to vector<128xf32>
      %39 = vector.shape_cast %38 : vector<128xf32> to vector<128x1xf32>
      %cst_25 = arith.constant 3.125000e-02 : f32
      %40 = vector.broadcast %cst_25 : f32 to vector<128x1xf32>
      %41 = arith.mulf %39, %40 : vector<128x1xf32>
      %cst_26 = arith.constant 9.99999974E-6 : f32
      %42 = vector.broadcast %cst_26 : f32 to vector<128x1xf32>
      %43 = arith.addf %41, %42 : vector<128x1xf32>
      %44 = math.rsqrt %43 : vector<128x1xf32>
      %45 = vector.broadcast %44 : vector<128x1xf32> to vector<128x128xf32>
      %46 = arith.mulf %36, %45 : vector<128x128xf32>
      %47 = vector.broadcast %22 : vector<1x128xf32> to vector<128x128xf32>
      %48 = arith.mulf %46, %47 : vector<128x128xf32>
      %49 = vector.broadcast %23 : vector<1x128xf32> to vector<128x128xf32>
      %50 = arith.addf %48, %49 : vector<128x128xf32>
      %cst_27 = arith.constant 0.000000e+00 : f32
      %51 = vector.broadcast %cst_27 : f32 to vector<128x128xf32>
      %52 = arith.maximumf %50, %51 : vector<128x128xf32>
      %53 = arith.truncf %52 : vector<128x128xf32> to vector<128x128xbf16>
      %c0_28 = arith.constant 0 : index
      %c0_29 = arith.constant 0 : index
      %54 = vector.load %arg8[%c0_28, %c0_29] : memref<128x128xbf16, #tpu.memory_space<vmem>>, vector<128x128xbf16>
      %cst_30 = arith.constant dense<0.000000e+00> : vector<128x128xf32>
      %55 = tpu.matmul %53, %54, %cst_30 {dimension_numbers = #tpu.dot_dimension_numbers<[1], [0], [0], [1], [0, 0, 1, 1], [], []>} : vector<128x128xbf16>, vector<128x128xbf16>, vector<128x128xf32> -> vector<128x128xf32>
      %c0_31 = arith.constant 0 : index
      %c0_32 = arith.constant 0 : index
      %56 = vector.load %arg9[%c0_31, %c0_32] : memref<1x128xf32, #tpu.memory_space<vmem>>, vector<1x128xf32>
      %57 = vector.broadcast %56 : vector<1x128xf32> to vector<128x128xf32>
      %58 = arith.addf %55, %57 : vector<128x128xf32>
      %c0_33 = arith.constant 0 : index
      %c0_34 = arith.constant 0 : index
      %59 = vector.load %arg10[%c0_33, %c0_34] : memref<1x128xf32, #tpu.memory_space<vmem>>, vector<1x128xf32>
      %c0_35 = arith.constant 0 : index
      %c0_36 = arith.constant 0 : index
      %60 = vector.load %arg11[%c0_35, %c0_36] : memref<1x128xf32, #tpu.memory_space<vmem>>, vector<1x128xf32>
      %61 = tpu.iota {dimensions = array<i32: 1>} : vector<1x128xi32>
      %c32_i32_37 = arith.constant 32 : i32
      %62 = vector.broadcast %c32_i32_37 : i32 to vector<1x128xi32>
      %63 = arith.cmpi slt, %61, %62 : vector<1x128xi32>
      %cst_38 = arith.constant dense<0.000000e+00> : vector<128xf32>
      %64 = vector.multi_reduction <add>, %58, %cst_38 [1] : vector<128x128xf32> to vector<128xf32>
      %65 = vector.shape_cast %64 : vector<128xf32> to vector<128x1xf32>
      %cst_39 = arith.constant 3.125000e-02 : f32
      %66 = vector.broadcast %cst_39 : f32 to vector<128x1xf32>
      %67 = arith.mulf %65, %66 : vector<128x1xf32>
      %68 = vector.broadcast %67 : vector<128x1xf32> to vector<128x128xf32>
      %69 = arith.subf %58, %68 : vector<128x128xf32>
      %cst_40 = arith.constant 0.000000e+00 : f32
      %70 = vector.shape_cast %63 : vector<1x128xi1> to vector<1x128xi1>
      %71 = vector.broadcast %70 : vector<1x128xi1> to vector<128x128xi1>
      %72 = vector.broadcast %cst_40 : f32 to vector<128x128xf32>
      %73 = arith.select %71, %69, %72 : vector<128x128xi1>, vector<128x128xf32>
      %74 = arith.mulf %73, %73 : vector<128x128xf32>
      %cst_41 = arith.constant dense<0.000000e+00> : vector<128xf32>
      %75 = vector.multi_reduction <add>, %74, %cst_41 [1] : vector<128x128xf32> to vector<128xf32>
      %76 = vector.shape_cast %75 : vector<128xf32> to vector<128x1xf32>
      %cst_42 = arith.constant 3.125000e-02 : f32
      %77 = vector.broadcast %cst_42 : f32 to vector<128x1xf32>
      %78 = arith.mulf %76, %77 : vector<128x1xf32>
      %cst_43 = arith.constant 9.99999974E-6 : f32
      %79 = vector.broadcast %cst_43 : f32 to vector<128x1xf32>
      %80 = arith.addf %78, %79 : vector<128x1xf32>
      %81 = math.rsqrt %80 : vector<128x1xf32>
      %82 = vector.broadcast %81 : vector<128x1xf32> to vector<128x128xf32>
      %83 = arith.mulf %73, %82 : vector<128x128xf32>
      %84 = vector.broadcast %59 : vector<1x128xf32> to vector<128x128xf32>
      %85 = arith.mulf %83, %84 : vector<128x128xf32>
      %86 = vector.broadcast %60 : vector<1x128xf32> to vector<128x128xf32>
      %87 = arith.addf %85, %86 : vector<128x128xf32>
      %cst_44 = arith.constant 0.000000e+00 : f32
      %88 = vector.broadcast %cst_44 : f32 to vector<128x128xf32>
      %89 = arith.maximumf %87, %88 : vector<128x128xf32>
      %90 = arith.truncf %89 : vector<128x128xf32> to vector<128x128xbf16>
      %91 = arith.index_cast %13 : i32 to index
      %c0_45 = arith.constant 0 : index
      %92 = vector.load %arg12[%91, %c0_45] : memref<128x128xbf16, #tpu.memory_space<vmem>>, vector<128x128xbf16>
      tpu.vector_store %arg12[%91, %c0_45], %90 {strides = array<i32>} : memref<128x128xbf16, #tpu.memory_space<vmem>>, vector<128x128xbf16>,
      %c1_i32 = arith.constant 1 : i32
    } else {
    }
    return
  }
  func.func @transform_0(%arg0: i32, %arg1: i32) -> (i32, i32) {
    %c0_i32 = arith.constant 0 : i32
    return %arg0, %arg1 : i32, i32
  }
  func.func @transform_1(%arg0: i32, %arg1: i32) -> (i32, i32) {
    %c0_i32 = arith.constant 0 : i32
    %c0_i32_0 = arith.constant 0 : i32
    return %arg1, %c0_i32 : i32, i32
  }
  func.func @transform_2(%arg0: i32, %arg1: i32) -> (i32, i32) {
    %c0_i32 = arith.constant 0 : i32
    %c0_i32_0 = arith.constant 0 : i32
    %c0_i32_1 = arith.constant 0 : i32
    return %c0_i32, %c0_i32_0 : i32, i32
  }
  func.func @transform_3(%arg0: i32, %arg1: i32) -> (i32, i32) {
    %c0_i32 = arith.constant 0 : i32
    %c0_i32_0 = arith.constant 0 : i32
    %c0_i32_1 = arith.constant 0 : i32
    return %c0_i32, %c0_i32_0 : i32, i32
  }
  func.func @transform_4(%arg0: i32, %arg1: i32) -> (i32, i32) {
    %c0_i32 = arith.constant 0 : i32
    %c0_i32_0 = arith.constant 0 : i32
    %c0_i32_1 = arith.constant 0 : i32
    return %c0_i32, %c0_i32_0 : i32, i32
  }
  func.func @transform_5(%arg0: i32, %arg1: i32) -> (i32, i32) {
    %c0_i32 = arith.constant 0 : i32
    %c0_i32_0 = arith.constant 0 : i32
    %c0_i32_1 = arith.constant 0 : i32
    return %c0_i32, %c0_i32_0 : i32, i32
  }
  func.func @transform_6(%arg0: i32, %arg1: i32) -> (i32, i32) {
    %c0_i32 = arith.constant 0 : i32
    %c0_i32_0 = arith.constant 0 : i32
    %c0_i32_1 = arith.constant 0 : i32
    return %c0_i32, %c0_i32_0 : i32, i32
  }
  func.func @transform_7(%arg0: i32, %arg1: i32) -> (i32, i32) {
    %c0_i32 = arith.constant 0 : i32
    %c0_i32_0 = arith.constant 0 : i32
    %c0_i32_1 = arith.constant 0 : i32
    return %c0_i32, %c0_i32_0 : i32, i32
  }
  func.func @transform_8(%arg0: i32, %arg1: i32) -> (i32, i32) {
    %c0_i32 = arith.constant 0 : i32
    %c0_i32_0 = arith.constant 0 : i32
    %c0_i32_1 = arith.constant 0 : i32
    return %c0_i32, %c0_i32_0 : i32, i32
  }
  func.func @transform_9(%arg0: i32, %arg1: i32) -> (i32, i32) {
    %c0_i32 = arith.constant 0 : i32
    %c0_i32_0 = arith.constant 0 : i32
    %c0_i32_1 = arith.constant 0 : i32
    return %c0_i32, %c0_i32_0 : i32, i32
  }
  func.func @transform_10(%arg0: i32, %arg1: i32) -> (i32, i32) {
    %c0_i32 = arith.constant 0 : i32
    %c0_i32_0 = arith.constant 0 : i32
    return %arg0, %c0_i32 : i32, i32
  }
}

</mosaic_0001>

<bundles_post_ra>
// kernel: tpu_custom_call.1
= control target key start
LH: loop header
LB: loop body
LE: loop exit
PB: predicated region body
PF: predicated region fallthrough
CT: control target
= control target key end

     0   :  { %15 = vsyncpa [#allocation4], 0  ;;  %s2365_s0 = inlined_call_operand.hbm [shape: bf16[128,128], index: 0, kind: input, shape index: {}]   ;;  %s2366_s1 = inlined_call_operand.hbm [shape: bf16[128,128], index: 1, kind: input, shape index: {}]   ;;  %s2367_s2 = inlined_call_operand.hbm [shape: bf16[128,128], index: 2, kind: input, shape index: {}]   ;;  %s2368_s3 = inlined_call_operand.vmem [shape: f32[1,128], index: 3, kind: input, shape index: {}]   ;;  %s2369_s4 = inlined_call_operand.vmem [shape: f32[1,128], index: 4, kind: input, shape index: {}]   ;;  %s2370_s5 = inlined_call_operand.vmem [shape: f32[1,128], index: 5, kind: input, shape index: {}]   ;;  %s2371_s6 = inlined_call_operand.hbm [shape: bf16[128,128], index: 6, kind: input, shape index: {}]   ;;  %s2372_s7 = inlined_call_operand.vmem [shape: f32[1,128], index: 7, kind: input, shape index: {}]   ;;  %s2373_s8 = inlined_call_operand.vmem [shape: f32[1,128], index: 8, kind: input, shape index: {}]   ;;  %s2374_s9 = inlined_call_operand.vmem [shape: f32[1,128], index: 9, kind: input, shape index: {}]   ;;  %s2375_s10 = inlined_call_operand.hbm [shape: bf16[128,128], index: 10, kind: output, shape index: {}]  }
   0x1   :  { %16 = vsyncpa [#allocation7], 0 }
   0x2   :  { %17 = vsyncpa [#allocation10], 0 }
   0x3   :  { %18 = vsyncpa [#allocation5], 0  ;;  %s1856_s13 = smov [#allocation6]   ;;  %s1857_s15 = smov [#allocation3]  }
   0x4   :  { %s36_s14 = sshll.u32 %s1856_s13, 4  ;;  %s24_s16 = sshll.u32 %s1857_s15, 4  ;;  %s37_s14 = int_to_ptr.vmem [resolvable:$true] %s36_s14  ;;  %s25_s16 = int_to_ptr.vmem [resolvable:$true] %s24_s16 }
   0x5   :  { %s1756_s17 = scalar_lea.vmem %s37_s14, 1024  ;;  %p1761_p1 = scmp.lt.s32.totalorder %s37_s14, %s37_s14 }
   0x6   :  { %p1757_p0 = scmp.ne.s32.totalorder %s37_s14, %s1756_s17  ;;  %p1762_p2 = scmp.lt.s32.totalorder %s1756_s17, %s1756_s17 }
   0x8   :  { %p1763_p3 = por %p1762_p2, %p1761_p1 }
   0xa   :  { %p1764_p4 = pnand %p1763_p3, %p1757_p0 }
   0xc   :  { %1767 = shalt.err (!%p1764_p4)
}
   0xd   :  { %s1858_s18 = smov 64   ;;  %s1859_s19 = smov 4  }
   0xe   :  { %42 = dma.hbm_to_vmem [thread:$0]  %s2366_s1, 1024, %s37_s14, [#allocation7], %s1858_s18, %s1858_s18, %s1859_s19  }
   0xf   :  { %s1776_s22 = scalar_lea.vmem %s25_s16, 1024  ;;  %p1781_p6 = scmp.lt.s32.totalorder %s25_s16, %s25_s16 }
  0x10   :  { %p1777_p5 = scmp.ne.s32.totalorder %s25_s16, %s1776_s22  ;;  %p1782_p7 = scmp.lt.s32.totalorder %s1776_s22, %s1776_s22 }
  0x12   :  { %p1783_p8 = por %p1782_p7, %p1781_p6 }
  0x14   :  { %p1784_p9 = pnand %p1783_p8, %p1777_p5 }
  0x16   :  { %1787 = shalt.err (!%p1784_p9)
}
  0x17   :  { %30 = dma.hbm_to_vmem [thread:$0]  %s2365_s0, 1024, %s25_s16, [#allocation4], %s1858_s18, %s1858_s18, %s1859_s19  }
  0x18   :  { %s1860_s25 = smov [#allocation8]   ;;  %s1861_s27 = smov [#allocation9]  }
  0x19   :  { %s48_s26 = sshll.u32 %s1860_s25, 4  ;;  %s66_s28 = sshll.u32 %s1861_s27, 4  ;;  %s49_s26 = int_to_ptr.vmem [resolvable:$true] %s48_s26  ;;  %s67_s28 = int_to_ptr.vmem [resolvable:$true] %s66_s28 }
  0x1a   :  { %s1796_s1 = scalar_lea.vmem %s49_s26, 1024  ;;  %p1801_p11 = scmp.lt.s32.totalorder %s49_s26, %s49_s26 }
  0x1b   :  { %p1797_p10 = scmp.ne.s32.totalorder %s49_s26, %s1796_s1  ;;  %p1802_p12 = scmp.lt.s32.totalorder %s1796_s1, %s1796_s1 }
  0x1d   :  { %p1803_p13 = por %p1802_p12, %p1801_p11 }
  0x1f   :  { %p1804_p0 = pnand %p1803_p13, %p1797_p10 }
  0x21   :  { %1807 = shalt.err (!%p1804_p0)
}
  0x22   :  { %54 = dma.hbm_to_vmem [thread:$0]  %s2367_s2, 1024, %s49_s26, [#allocation7], %s1858_s18, %s1858_s18, %s1859_s19  }
  0x23   :  { %s1816_s0 = scalar_lea.vmem %s67_s28, 1024  ;;  %p1821_p2 = scmp.lt.s32.totalorder %s67_s28, %s67_s28 }
  0x24   :  { %p1817_p1 = scmp.ne.s32.totalorder %s67_s28, %s1816_s0  ;;  %p1822_p3 = scmp.lt.s32.totalorder %s1816_s0, %s1816_s0 }
  0x26   :  { %p1823_p4 = por %p1822_p3, %p1821_p2 }
  0x28   :  { %p1824_p5 = pnand %p1823_p4, %p1817_p1 }
  0x2a   :  { %1827 = shalt.err (!%p1824_p5)
}
  0x2b   :  { %72 = dma.hbm_to_vmem [thread:$0]  %s2371_s6, 1024, %s67_s28, [#allocation10], %s1858_s18, %s1858_s18, %s1859_s19  }
  0x2c   :  { %1848 = dma.done.wait [#allocation4], 1024  }
  0x2d   :  { %1849 = vsyncadd [#allocation4], 4294966272 }
  0x2e   :  { %1850 = dma.done.wait [#allocation7], 2048  }
  0x2f   :  { %1851 = vsyncadd [#allocation7], 4294965248 }
  0x30   :  { %1852 = dma.done.wait [#allocation10], 1024  }
  0x31   :  { %1853 = vsyncadd [#allocation10], 4294966272  ;;  %v1652_v0 = vld [vmem:[#allocation6 + $0x38] sm:$0xff]   ;;  %v1653_v1 = vld [vmem:[#allocation6 + $0x30] sm:$0xff]  }
  0x32   :  { %1533 = vmatprep.subr.bf16.mxu0 %v1652_v0  ;;  %v1654_v2 = vld [vmem:[#allocation6 + $0x28] sm:$0xff]   ;;  %v1655_v3 = vld [vmem:[#allocation6 + $0x20] sm:$0xff]   ;;  %v1656_v5 = vld [vmem:[#allocation6 + $0x18] sm:$0xff]  }
  0x33   :  { %1534 = vmatpush3.bf16.msra.mxu0 %v1652_v0  ;;  %v1660_v4 = vld [vmem:[#allocation3] sm:$0xff]   ;;  %v1657_v6 = vld [vmem:[#allocation6 + $0x10] sm:$0xff]   ;;  %v1668_v7 = vld [vmem:[#allocation8 + $0x38] sm:$0xff]  }
  0x34   :  { %1535 = vmatprep.subr.bf16.mxu0 %v1653_v1  ;;  %1549 = vmatprep.mubr.bf16.mxu0 %v1660_v4  ;;  %v1669_v8 = vld [vmem:[#allocation8 + $0x30] sm:$0xff]   ;;  %v1658_v9 = vld [vmem:[#allocation6 + $0x8] sm:$0xff]   ;;  %v1659_v11 = vld [vmem:[#allocation6] sm:$0xff]  }
  0x35   :  { %1565 = vmatprep.subr.bf16.mxu1 %v1668_v7  ;;  %v1670_v10 = vld [vmem:[#allocation8 + $0x28] sm:$0xff]   ;;  %v1671_v12 = vld [vmem:[#allocation8 + $0x20] sm:$0xff]   ;;  %v1672_v13 = vld [vmem:[#allocation8 + $0x18] sm:$0xff]  }
  0x36   :  { %1566 = vmatpush3.bf16.msra.mxu1 %v1668_v7  ;;  %v1661_v14 = vld [vmem:[#allocation3 + $0x8] sm:$0xff]   ;;  %v1662_v15 = vld [vmem:[#allocation3 + $0x10] sm:$0xff]   ;;  %v1663_v17 = vld [vmem:[#allocation3 + $0x18] sm:$0xff]  }
  0x37   :  { %1536 = vmatpush3.bf16.msra.mxu0 %v1653_v1  ;;  %1567 = vmatprep.subr.bf16.mxu1 %v1669_v8  ;;  %v1673_v16 = vld [vmem:[#allocation8 + $0x10] sm:$0xff]   ;;  %v1664_v18 = vld [vmem:[#allocation3 + $0x20] sm:$0xff]   ;;  %v1665_v19 = vld [vmem:[#allocation3 + $0x28] sm:$0xff]  }
  0x38   :  { %1537 = vmatprep.subr.bf16.mxu0 %v1654_v2  ;;  %v1666_v20 = vld [vmem:[#allocation3 + $0x30] sm:$0xff]   ;;  %v1667_v21 = vld [vmem:[#allocation3 + $0x38] sm:$0xff]   ;;  %v1674_v22 = vld [vmem:[#allocation8 + $0x8] sm:$0xff]  }
  0x39   :  { %v1675_v23 = vld [vmem:[#allocation8] sm:$0xff]  }
  0x3a   :  { %1568 = vmatpush3.bf16.msra.mxu1 %v1669_v8  ;;  %v1384_v48 = vld [vmem:[%s2368_s3] ss:$0 sm:$0xff] }
  0x3b   :  { %1538 = vmatpush3.bf16.msra.mxu0 %v1654_v2  ;;  %1569 = vmatprep.subr.bf16.mxu1 %v1670_v10 }
  0x3c   :  { %1539 = vmatprep.subr.bf16.mxu0 %v1655_v3 }
  0x3e   :  { %1570 = vmatpush3.bf16.msra.mxu1 %v1670_v10 }
  0x3f   :  { %1540 = vmatpush3.bf16.msra.mxu0 %v1655_v3  ;;  %1571 = vmatprep.subr.bf16.mxu1 %v1671_v12 }
  0x40   :  { %1541 = vmatprep.subr.bf16.mxu0 %v1656_v5 }
  0x42   :  { %1572 = vmatpush3.bf16.msra.mxu1 %v1671_v12 }
  0x43   :  { %1542 = vmatpush3.bf16.msra.mxu0 %v1656_v5  ;;  %1573 = vmatprep.subr.bf16.mxu1 %v1672_v13 }
  0x44   :  { %1543 = vmatprep.subr.bf16.mxu0 %v1657_v6 }
  0x46   :  { %1574 = vmatpush3.bf16.msra.mxu1 %v1672_v13 }
  0x47   :  { %1544 = vmatpush3.bf16.msra.mxu0 %v1657_v6  ;;  %1575 = vmatprep.subr.bf16.mxu1 %v1673_v16 }
  0x48   :  { %1545 = vmatprep.subr.bf16.mxu0 %v1658_v9 }
  0x4a   :  { %1576 = vmatpush3.bf16.msra.mxu1 %v1673_v16 }
  0x4b   :  { %1546 = vmatpush3.bf16.msra.mxu0 %v1658_v9  ;;  %1577 = vmatprep.subr.bf16.mxu1 %v1674_v22 }
  0x4c   :  { %1547 = vmatprep.subr.bf16.mxu0 %v1659_v11 }
  0x4e   :  { %1578 = vmatpush3.bf16.msra.mxu1 %v1674_v22 }
  0x4f   :  { %1548 = vmatpush3.bf16.msra.mxu0 %v1659_v11  ;;  %1579 = vmatprep.subr.bf16.mxu1 %v1675_v23 }
  0x52   :  { %1550 = vmatmul.mubr.bf16.vlgmr.msra.gmra.mxu0 %v1661_v14  ;;  %1580 = vmatpush3.bf16.msra.mxu1 %v1675_v23 }
  0x53   :  { %1553 = vmatprep.mubr.bf16.mxu0 %v1662_v15 }
  0x5a   :  { %1554 = vmatmul.mubr.bf16.gmra.mxu0 %v1663_v17  ;;  %v582_v17 = vlaneseq }
  0x5b   :  { %1557 = vmatprep.mubr.bf16.mxu0 %v1664_v18 }
  0x5c   :  { %v1984_v18 = vand.u32 127, %v582_v17 }
  0x5e   :  { %vm584_vm0 = vcmp.lt.s32.totalorder %v1984_v18, 32 }
  0x62   :  { %1558 = vmatmul.mubr.bf16.gmra.mxu0 %v1665_v19 }
  0x63   :  { %1561 = vmatprep.mubr.bf16.mxu0 %v1666_v20 }
  0x6a   :  { %1562 = vmatmul.mubr.bf16.gmra.mxu0 %v1667_v21 }
 0x112   :  { %v1551_v24 = vpop.f32.mrf.mxu0 }
 0x114   :  { %v290_v25 = vpop.f32.mrf.mxu0 }
 0x116   :  { %v1552_v26 = vpop.f32.mrf.mxu0 }
 0x117   :  { %v405_v29 = vpack.c.bf16 %v1552_v26, %v1551_v24 }
 0x118   :  { %v293_v27 = vpop.f32.mrf.mxu0 }
 0x119   :  { %v404_v28 = vpack.c.bf16 %v293_v27, %v290_v25 }
 0x11a   :  { %v1555_v30 = vpop.f32.mrf.mxu0 }
 0x11b   :  { %1581 = vmatprep.mubr.bf16.mxu1 %v404_v28 }
 0x11c   :  { %v306_v31 = vpop.f32.mrf.mxu0  ;;  %1582 = vmatmul.mubr.bf16.vlgmr.msra.gmra.mxu1 %v405_v29 }
 0x11e   :  { %v1556_v32 = vpop.f32.mrf.mxu0 }
 0x11f   :  { %v407_v35 = vpack.c.bf16 %v1556_v32, %v1555_v30 }
 0x120   :  { %v309_v33 = vpop.f32.mrf.mxu0 }
 0x121   :  { %v406_v34 = vpack.c.bf16 %v309_v33, %v306_v31 }
 0x122   :  { %v1559_v36 = vpop.f32.mrf.mxu0 }
 0x123   :  { %1585 = vmatprep.mubr.bf16.mxu1 %v406_v34 }
 0x124   :  { %v322_v37 = vpop.f32.mrf.mxu0  ;;  %1586 = vmatmul.mubr.bf16.gmra.mxu1 %v407_v35 }
 0x126   :  { %v1560_v38 = vpop.f32.mrf.mxu0 }
 0x127   :  { %v409_v41 = vpack.c.bf16 %v1560_v38, %v1559_v36 }
 0x128   :  { %v325_v39 = vpop.f32.mrf.mxu0 }
 0x129   :  { %v408_v40 = vpack.c.bf16 %v325_v39, %v322_v37 }
 0x12a   :  { %v1563_v42 = vpop.f32.mrf.mxu0 }
 0x12b   :  { %1589 = vmatprep.mubr.bf16.mxu1 %v408_v40 }
 0x12c   :  { %v338_v43 = vpop.f32.mrf.mxu0  ;;  %1590 = vmatmul.mubr.bf16.gmra.mxu1 %v409_v41 }
 0x12e   :  { %v1564_v44 = vpop.f32.mrf.mxu0 }
 0x12f   :  { %v411_v45 = vpack.c.bf16 %v1564_v44, %v1563_v42 }
 0x130   :  { %v341_v46 = vpop.f32.mrf.mxu0 }
 0x131   :  { %v410_v47 = vpack.c.bf16 %v341_v46, %v338_v43 }
 0x133   :  { %1593 = vmatprep.mubr.bf16.mxu1 %v410_v47 }
 0x134   :  { %1594 = vmatmul.mubr.bf16.gmra.mxu1 %v411_v45 }
 0x1dc   :  { %v1583_v49 = vpop.f32.mrf.mxu1 }
 0x1dd   :  { %v526_v50 = vadd.f32 %v1583_v49, %v1384_v48 }
 0x1de   :  { %v517_v51 = vpop.f32.mrf.mxu1 }
 0x1df   :  { %589 = vadd.xlane.f32.xlu0 %v526_v50  ;;  %v518_v53 = vadd.f32 %v1384_v48, %v517_v51 }
 0x1e0   :  { %v1584_v52 = vpop.f32.mrf.mxu1 }
 0x1e1   :  { %v529_v54 = vadd.f32 %v1584_v52, %v1384_v48 }
 0x1e2   :  { %v520_v55 = vpop.f32.mrf.mxu1 }
 0x1e3   :  { %591 = vadd.xlane.f32.xlu1 %v529_v54  ;;  %585 = vadd.xlane.f32.xlu0 %v518_v53  ;;  %v1945_v57 = vadd.f32 %v1384_v48, %v520_v55 }
 0x1e4   :  { %v1587_v56 = vpop.f32.mrf.mxu1 }
 0x1e5   :  { %v1948_v60 = vadd.f32 %v1587_v56, %v1384_v48  ;;  %v1676_v56 = vld [vmem:[#allocation9 + $0x38] sm:$0xff]  }
 0x1e6   :  { %v533_v58 = vpop.f32.mrf.mxu1  ;;  %1597 = vmatprep.subr.bf16.mxu0 %v1676_v56  ;;  %1629 = vmatprep.subr.bf16.mxu1 %v1676_v56 }
 0x1e7   :  { %587 = vadd.xlane.f32.xlu0 %v1945_v57  ;;  %v1953_v0 = vadd.f32 %v1384_v48, %v533_v58  ;;  %1598 = vmatpush3.bf16.msra.mxu0 %v1676_v56 }
 0x1e8   :  { %v1588_v59 = vpop.f32.mrf.mxu1  ;;  %1637 = vmatpush3.bf16.msra.mxu1 %v1676_v56 }
 0x1e9   :  { %v1972_v12 = vadd.f32 %v1588_v59, %v1384_v48 }
 0x1ea   :  { %v536_v61 = vpop.f32.mrf.mxu1 }
 0x1eb   :  { %v1950_v62 = vadd.f32 %v1384_v48, %v536_v61  ;;  %597 = vadd.xlane.f32.xlu0 %v1948_v60 }
 0x1ec   :  { %v1591_v63 = vpop.f32.mrf.mxu1 }
 0x1ed   :  { %595 = vadd.xlane.f32.xlu1 %v1950_v62  ;;  %v1959_v4 = vadd.f32 %v1591_v63, %v1384_v48 }
 0x1ee   :  { %v549_v1 = vpop.f32.mrf.mxu1 }
 0x1ef   :  { %v1956_v2 = vadd.f32 %v1384_v48, %v549_v1  ;;  %593 = vadd.xlane.f32.xlu0 %v1953_v0 }
 0x1f0   :  { %v1592_v3 = vpop.f32.mrf.mxu1 }
 0x1f1   :  { %601 = vadd.xlane.f32.xlu1 %v1956_v2  ;;  %v1962_v6 = vadd.f32 %v1592_v3, %v1384_v48  ;;  %v1677_v3 = vld [vmem:[#allocation9 + $0x30] sm:$0xff]  }
 0x1f2   :  { %v552_v5 = vpop.f32.mrf.mxu1  ;;  %1599 = vmatprep.subr.bf16.mxu0 %v1677_v3  ;;  %1630 = vmatprep.subr.bf16.mxu1 %v1677_v3 }
 0x1f3   :  { %605 = vadd.xlane.f32.xlu0 %v1959_v4  ;;  %v1966_v9 = vadd.f32 %v1384_v48, %v552_v5  ;;  %1600 = vmatpush3.bf16.msra.mxu0 %v1677_v3 }
 0x1f4   :  { %v1595_v7 = vpop.f32.mrf.mxu1  ;;  %1638 = vmatpush3.bf16.msra.mxu1 %v1677_v3 }
 0x1f5   :  { %607 = vadd.xlane.f32.xlu1 %v1962_v6  ;;  %v1974_v13 = vadd.f32 %v1595_v7, %v1384_v48 }
 0x1f6   :  { %v565_v8 = vpop.f32.mrf.mxu1 }
 0x1f7   :  { %v1968_v10 = vadd.f32 %v1384_v48, %v565_v8 }
 0x1f8   :  { %v1596_v11 = vpop.f32.mrf.mxu1 }
 0x1f9   :  { %603 = vadd.xlane.f32.xlu1 %v1966_v9  ;;  %609 = vadd.xlane.f32.xlu0 %v1968_v10  ;;  %v1981_v16 = vadd.f32 %v1596_v11, %v1384_v48 }
 0x1fa   :  { %v568_v14 = vpop.f32.mrf.mxu1 }
 0x1fb   :  { %v1978_v15 = vadd.f32 %v1384_v48, %v568_v14 }
 0x1fd   :  { %599 = vadd.xlane.f32.xlu1 %v1972_v12  ;;  %613 = vadd.xlane.f32.xlu0 %v1974_v13 }
 0x201   :  { %611 = vadd.xlane.f32.xlu1 %v1978_v15 }
 0x205   :  { %615 = vadd.xlane.f32.xlu1 %v1981_v16 }
 0x268   :  { %v590_v19 = vpop.xlane.xlu0 %589 }
 0x269   :  { %v619_v20 = vmul.f32 0.03125, %v590_v19 }
 0x26b   :  { %v635_v21 = vsub.f32 %v526_v50, %v619_v20  ;;  %v1678_v20 = vld [vmem:[#allocation9 + $0x28] sm:$0xff]  }
 0x26c   :  { %v592_v22 = vpop.xlane.xlu1 %591  ;;  %v586_v23 = vpop.xlane.xlu0 %585  ;;  %1601 = vmatprep.subr.bf16.mxu0 %v1678_v20  ;;  %1631 = vmatprep.subr.bf16.mxu1 %v1678_v20 }
 0x26d   :  { %v620_v24 = vmul.f32 0.03125, %v592_v22  ;;  %v617_v25 = vmul.f32 0.03125, %v586_v23  ;;  %v1989_v26 = vsel %vm584_vm0, %v635_v21, 0.0  ;;  %1602 = vmatpush3.bf16.msra.mxu0 %v1678_v20  ;;  %1639 = vmatpush3.bf16.msra.mxu1 %v1678_v20 }
 0x26e   :  { %v669_v27 = vmul.f32 %v1989_v26, %v1989_v26 }
 0x26f   :  { %v636_v28 = vsub.f32 %v529_v54, %v620_v24  ;;  %v633_v29 = vsub.f32 %v518_v53, %v617_v25 }
 0x270   :  { %v588_v30 = vpop.xlane.xlu0 %587  ;;  %687 = vadd.xlane.f32.xlu0 %v669_v27 }
 0x271   :  { %v618_v31 = vmul.f32 0.03125, %v588_v30  ;;  %v1995_v32 = vsel %vm584_vm0, %v636_v28, 0.0  ;;  %v1999_v33 = vsel %vm584_vm0, %v633_v29, 0.0  ;;  %v1679_v28 = vld [vmem:[#allocation9 + $0x20] sm:$0xff]  }
 0x272   :  { %v670_v34 = vmul.f32 %v1995_v32, %v1995_v32  ;;  %v667_v35 = vmul.f32 %v1999_v33, %v1999_v33  ;;  %1603 = vmatprep.subr.bf16.mxu0 %v1679_v28  ;;  %1632 = vmatprep.subr.bf16.mxu1 %v1679_v28 }
 0x273   :  { %v634_v36 = vsub.f32 %v1945_v57, %v618_v31  ;;  %1604 = vmatpush3.bf16.msra.mxu0 %v1679_v28  ;;  %1640 = vmatpush3.bf16.msra.mxu1 %v1679_v28 }
 0x274   :  { %v598_v37 = vpop.xlane.xlu0 %597  ;;  %689 = vadd.xlane.f32.xlu1 %v670_v34  ;;  %683 = vadd.xlane.f32.xlu0 %v667_v35 }
 0x275   :  { %v2008_v38 = vsel %vm584_vm0, %v634_v36, 0.0  ;;  %v623_v53 = vmul.f32 0.03125, %v598_v37  ;;  %v1680_v37 = vld [vmem:[#allocation9 + $0x18] sm:$0xff]  }
 0x276   :  { %v596_v39 = vpop.xlane.xlu1 %595  ;;  %v668_v40 = vmul.f32 %v2008_v38, %v2008_v38  ;;  %1605 = vmatprep.subr.bf16.mxu0 %v1680_v37  ;;  %1633 = vmatprep.subr.bf16.mxu1 %v1680_v37 }
 0x277   :  { %v622_v41 = vmul.f32 0.03125, %v596_v39  ;;  %v639_v63 = vsub.f32 %v1948_v60, %v623_v53  ;;  %1606 = vmatpush3.bf16.msra.mxu0 %v1680_v37  ;;  %1641 = vmatpush3.bf16.msra.mxu1 %v1680_v37  ;;  %v2110_v37 = vld [vmem:[%s2370_s5] ss:$0 sm:$0xff] }
 0x278   :  { %v594_v42 = vpop.xlane.xlu0 %593  ;;  %685 = vadd.xlane.f32.xlu1 %v668_v40 }
 0x279   :  { %v638_v43 = vsub.f32 %v1950_v62, %v622_v41  ;;  %v621_v44 = vmul.f32 0.03125, %v594_v42  ;;  %v2051_v19 = vsel %vm584_vm0, %v639_v63, 0.0 }
 0x27a   :  { %v602_v45 = vpop.xlane.xlu1 %601 }
 0x27b   :  { %v637_v46 = vsub.f32 %v1953_v0, %v621_v44  ;;  %v625_v47 = vmul.f32 0.03125, %v602_v45  ;;  %v2016_v48 = vsel %vm584_vm0, %v638_v43, 0.0  ;;  %v1681_v44 = vld [vmem:[#allocation9 + $0x10] sm:$0xff]  }
 0x27c   :  { %v606_v49 = vpop.xlane.xlu0 %605  ;;  %v672_v50 = vmul.f32 %v2016_v48, %v2016_v48  ;;  %1607 = vmatprep.subr.bf16.mxu0 %v1681_v44  ;;  %1634 = vmatprep.subr.bf16.mxu1 %v1681_v44 }
 0x27d   :  { %v627_v51 = vmul.f32 0.03125, %v606_v49  ;;  %v2022_v52 = vsel %vm584_vm0, %v637_v46, 0.0  ;;  %v641_v57 = vsub.f32 %v1956_v2, %v625_v47  ;;  %1608 = vmatpush3.bf16.msra.mxu0 %v1681_v44  ;;  %1642 = vmatpush3.bf16.msra.mxu1 %v1681_v44  ;;  %v1683_v47 = vld [vmem:[#allocation9] sm:$0xff]  }
 0x27e   :  { %v608_v54 = vpop.xlane.xlu1 %607  ;;  %693 = vadd.xlane.f32.xlu1 %v672_v50  ;;  %v671_v55 = vmul.f32 %v2022_v52, %v2022_v52 }
 0x27f   :  { %v643_v58 = vsub.f32 %v1959_v4, %v627_v51  ;;  %v628_v59 = vmul.f32 0.03125, %v608_v54  ;;  %v2042_v7 = vsel %vm584_vm0, %v641_v57, 0.0 }
 0x280   :  { %691 = vadd.xlane.f32.xlu0 %v671_v55  ;;  %v675_v17 = vmul.f32 %v2042_v7, %v2042_v7 }
 0x281   :  { %v644_v61 = vsub.f32 %v1962_v6, %v628_v59  ;;  %v2031_v62 = vsel %vm584_vm0, %v643_v58, 0.0 }
 0x282   :  { %v604_v0 = vpop.xlane.xlu1 %603  ;;  %v610_v1 = vpop.xlane.xlu0 %609  ;;  %v677_v2 = vmul.f32 %v2031_v62, %v2031_v62 }
 0x283   :  { %v626_v4 = vmul.f32 0.03125, %v604_v0  ;;  %v629_v5 = vmul.f32 0.03125, %v610_v1  ;;  %v2038_v6 = vsel %vm584_vm0, %v644_v61, 0.0 }
 0x284   :  { %703 = vadd.xlane.f32.xlu0 %v677_v2  ;;  %v678_v60 = vmul.f32 %v2038_v6, %v2038_v6 }
 0x285   :  { %v642_v8 = vsub.f32 %v1966_v9, %v626_v4  ;;  %v645_v21 = vsub.f32 %v1968_v10, %v629_v5  ;;  %v673_v10 = vmul.f32 %v2051_v19, %v2051_v19 }
 0x286   :  { %v600_v11 = vpop.xlane.xlu1 %599  ;;  %705 = vadd.xlane.f32.xlu1 %v678_v60  ;;  %v614_v14 = vpop.xlane.xlu0 %613 }
 0x287   :  { %v624_v22 = vmul.f32 0.03125, %v600_v11  ;;  %v631_v23 = vmul.f32 0.03125, %v614_v14  ;;  %v2056_v9 = vsel %vm584_vm0, %v642_v8, 0.0  ;;  %v2070_v34 = vsel %vm584_vm0, %v645_v21, 0.0 }
 0x288   :  { %699 = vadd.xlane.f32.xlu0 %v675_v17  ;;  %v676_v24 = vmul.f32 %v2056_v9, %v2056_v9  ;;  %v679_v36 = vmul.f32 %v2070_v34, %v2070_v34 }
 0x289   :  { %v640_v25 = vsub.f32 %v1972_v12, %v624_v22  ;;  %v647_v29 = vsub.f32 %v1974_v13, %v631_v23 }
 0x28a   :  { %701 = vadd.xlane.f32.xlu1 %v676_v24  ;;  %v612_v27 = vpop.xlane.xlu1 %611 }
 0x28b   :  { %v630_v30 = vmul.f32 0.03125, %v612_v27  ;;  %v2066_v31 = vsel %vm584_vm0, %v640_v25, 0.0  ;;  %v2083_v41 = vsel %vm584_vm0, %v647_v29, 0.0  ;;  %v2101_v25 = vld [vmem:[%s2369_s4] ss:$0 sm:$0xff] }
 0x28c   :  { %695 = vadd.xlane.f32.xlu0 %v673_v10  ;;  %v674_v12 = vmul.f32 %v2066_v31, %v2066_v31  ;;  %v681_v43 = vmul.f32 %v2083_v41, %v2083_v41 }
 0x28d   :  { %v646_v35 = vsub.f32 %v1978_v15, %v630_v30 }
 0x28e   :  { %697 = vadd.xlane.f32.xlu1 %v674_v12  ;;  %v616_v13 = vpop.xlane.xlu1 %615 }
 0x28f   :  { %v632_v39 = vmul.f32 0.03125, %v616_v13  ;;  %v2079_v40 = vsel %vm584_vm0, %v646_v35, 0.0 }
 0x290   :  { %707 = vadd.xlane.f32.xlu0 %v679_v36  ;;  %v680_v15 = vmul.f32 %v2079_v40, %v2079_v40 }
 0x291   :  { %v648_v42 = vsub.f32 %v1981_v16, %v632_v39  ;;  %v1682_v16 = vld [vmem:[#allocation9 + $0x8] sm:$0xff]  }
 0x292   :  { %709 = vadd.xlane.f32.xlu1 %v680_v15  ;;  %1609 = vmatprep.subr.bf16.mxu0 %v1682_v16 }
 0x293   :  { %v2092_v45 = vsel %vm584_vm0, %v648_v42, 0.0  ;;  %1635 = vmatprep.subr.bf16.mxu1 %v1682_v16  ;;  %1610 = vmatpush3.bf16.msra.mxu0 %v1682_v16 }
 0x294   :  { %711 = vadd.xlane.f32.xlu0 %v681_v43  ;;  %v682_v46 = vmul.f32 %v2092_v45, %v2092_v45  ;;  %1643 = vmatpush3.bf16.msra.mxu1 %v1682_v16 }
 0x295   :  { %1611 = vmatprep.subr.bf16.mxu0 %v1683_v47  ;;  %1636 = vmatprep.subr.bf16.mxu1 %v1683_v47 }
 0x296   :  { %713 = vadd.xlane.f32.xlu1 %v682_v46 }
 0x297   :  { %1612 = vmatpush3.bf16.msra.mxu0 %v1683_v47 }
 0x298   :  { %1644 = vmatpush3.bf16.msra.mxu1 %v1683_v47 }
 0x2f9   :  { %v688_v49 = vpop.xlane.xlu0 %687 }
 0x2fa   :  { %v717_v50 = vmul.f32 0.03125, %v688_v49 }
 0x2fc   :  { %v733_v51 = vadd.f32 1e-05, %v717_v50 }
 0x2fd   :  { %v690_v53 = vpop.xlane.xlu1 %689  ;;  %v684_v54 = vpop.xlane.xlu0 %683 }
 0x2fe   :  { %v718_v55 = vmul.f32 0.03125, %v690_v53  ;;  %v715_v56 = vmul.f32 0.03125, %v684_v54  ;;  %1684 = vrsqrt.f32 %v733_v51 }
 0x300   :  { %v734_v57 = vadd.f32 1e-05, %v718_v55  ;;  %v731_v58 = vadd.f32 1e-05, %v715_v56 }
 0x301   :  { %v686_v59 = vpop.xlane.xlu1 %685 }
 0x302   :  { %1686 = vrsqrt.f32 %v734_v57  ;;  %v716_v61 = vmul.f32 0.03125, %v686_v59 }
 0x303   :  { %1688 = vrsqrt.f32 %v731_v58 }
 0x304   :  { %v732_v63 = vadd.f32 1e-05, %v716_v61 }
 0x306   :  { %1690 = vrsqrt.f32 %v732_v63 }
 0x307   :  { %v694_v0 = vpop.xlane.xlu1 %693 }
 0x308   :  { %v720_v1 = vmul.f32 0.03125, %v694_v0 }
 0x309   :  { %v692_v2 = vpop.xlane.xlu0 %691 }
 0x30a   :  { %v736_v3 = vadd.f32 1e-05, %v720_v1  ;;  %v719_v4 = vmul.f32 0.03125, %v692_v2 }
 0x30b   :  { %v1685_v5 = vpop.eup %1684 }
 0x30c   :  { %1692 = vrsqrt.f32 %v736_v3  ;;  %v735_v60 = vadd.f32 1e-05, %v719_v4  ;;  %v765_v17 = vmul.f32 %v1685_v5, %v1989_v26 }
 0x30d   :  { %v704_v8 = vpop.xlane.xlu0 %703 }
 0x30e   :  { %1694 = vrsqrt.f32 %v735_v60  ;;  %v725_v11 = vmul.f32 0.03125, %v704_v8 }
 0x30f   :  { %v1687_v14 = vpop.eup %1686  ;;  %v706_v20 = vpop.xlane.xlu1 %705 }
 0x310   :  { %v1689_v21 = vpop.eup %1688  ;;  %v766_v22 = vmul.f32 %v1687_v14, %v1995_v32  ;;  %v741_v23 = vadd.f32 1e-05, %v725_v11  ;;  %v726_v24 = vmul.f32 0.03125, %v706_v20  ;;  %v787_v32 = vmul.f32 %v2101_v25, %v765_v17 }
 0x311   :  { %v700_v27 = vpop.xlane.xlu0 %699  ;;  %v763_v10 = vmul.f32 %v1689_v21, %v1999_v33 }
 0x312   :  { %1696 = vrsqrt.f32 %v741_v23  ;;  %v742_v28 = vadd.f32 1e-05, %v726_v24  ;;  %v723_v29 = vmul.f32 0.03125, %v700_v27  ;;  %v788_v30 = vmul.f32 %v2101_v25, %v766_v22 }
 0x313   :  { %v1691_v26 = vpop.eup %1690  ;;  %v702_v12 = vpop.xlane.xlu1 %701  ;;  %v785_v35 = vmul.f32 %v2101_v25, %v763_v10  ;;  %v809_v47 = vadd.f32 %v2110_v37, %v787_v32 }
 0x314   :  { %1698 = vrsqrt.f32 %v742_v28  ;;  %v739_v13 = vadd.f32 1e-05, %v723_v29  ;;  %v724_v36 = vmul.f32 0.03125, %v702_v12  ;;  %v764_v33 = vmul.f32 %v1691_v26, %v2008_v38 }
 0x315   :  { %v696_v39 = vpop.xlane.xlu0 %695  ;;  %v807_v15 = vadd.f32 %v2110_v37, %v785_v35  ;;  %v810_v42 = vadd.f32 %v2110_v37, %v788_v30  ;;  %v825_v63 = vmax.f32 %v809_v47, 0.0 }
 0x316   :  { %1700 = vrsqrt.f32 %v739_v13  ;;  %v740_v43 = vadd.f32 1e-05, %v724_v36  ;;  %v721_v44 = vmul.f32 0.03125, %v696_v39  ;;  %v786_v46 = vmul.f32 %v2101_v25, %v764_v33 }
 0x317   :  { %v698_v16 = vpop.xlane.xlu1 %697  ;;  %v823_v54 = vmax.f32 %v807_v15, 0.0  ;;  %v826_v55 = vmax.f32 %v810_v42, 0.0 }
 0x318   :  { %1702 = vrsqrt.f32 %v740_v43  ;;  %v737_v49 = vadd.f32 1e-05, %v721_v44  ;;  %v722_v50 = vmul.f32 0.03125, %v698_v16  ;;  %v808_v51 = vadd.f32 %v2110_v37, %v786_v46 }
 0x319   :  { %v1693_v53 = vpop.eup %1692  ;;  %v708_v38 = vpop.xlane.xlu0 %707  ;;  %v840_v5 = vpack.c.bf16 %v826_v55, %v825_v63 }
 0x31a   :  { %1704 = vrsqrt.f32 %v737_v49  ;;  %v738_v56 = vadd.f32 1e-05, %v722_v50  ;;  %v727_v57 = vmul.f32 0.03125, %v708_v38  ;;  %v824_v58 = vmax.f32 %v808_v51, 0.0 }
 0x31b   :  { %v1695_v59 = vpop.eup %1694  ;;  %v710_v61 = vpop.xlane.xlu1 %709  ;;  %v768_v0 = vmul.f32 %v1693_v53, %v2016_v48 }
 0x31c   :  { %1706 = vrsqrt.f32 %v738_v56  ;;  %v743_v1 = vadd.f32 1e-05, %v727_v57  ;;  %v728_v2 = vmul.f32 0.03125, %v710_v61  ;;  %v839_v3 = vpack.c.bf16 %v824_v58, %v823_v54 }
 0x31d   :  { %v712_v4 = vpop.xlane.xlu0 %711  ;;  %v767_v60 = vmul.f32 %v1695_v59, %v2022_v52  ;;  %v790_v8 = vmul.f32 %v2101_v25, %v768_v0 }
 0x31e   :  { %1708 = vrsqrt.f32 %v743_v1  ;;  %v744_v11 = vadd.f32 1e-05, %v728_v2  ;;  %v729_v14 = vmul.f32 0.03125, %v712_v4  ;;  %1613 = vmatprep.mubr.bf16.mxu0 %v839_v3 }
 0x31f   :  { %v1697_v17 = vpop.eup %1696  ;;  %v714_v20 = vpop.xlane.xlu1 %713  ;;  %1614 = vmatmul.mubr.bf16.vlgmr.msra.gmra.mxu0 %v840_v5  ;;  %v789_v21 = vmul.f32 %v2101_v25, %v767_v60  ;;  %v812_v48 = vadd.f32 %v2110_v37, %v790_v8 }
 0x320   :  { %1710 = vrsqrt.f32 %v744_v11  ;;  %v745_v22 = vadd.f32 1e-05, %v729_v14  ;;  %v730_v23 = vmul.f32 0.03125, %v714_v20  ;;  %v773_v27 = vmul.f32 %v1697_v17, %v2031_v62 }
 0x321   :  { %v1699_v24 = vpop.eup %1698  ;;  %v811_v52 = vadd.f32 %v2110_v37, %v789_v21  ;;  %v828_v26 = vmax.f32 %v812_v48, 0.0 }
 0x322   :  { %v774_v10 = vmul.f32 %v1699_v24, %v2038_v6  ;;  %1712 = vrsqrt.f32 %v745_v22  ;;  %v746_v28 = vadd.f32 1e-05, %v730_v23  ;;  %v795_v36 = vmul.f32 %v2101_v25, %v773_v27 }
 0x323   :  { %v1701_v29 = vpop.eup %1700  ;;  %v827_v30 = vmax.f32 %v811_v52, 0.0 }
 0x324   :  { %1714 = vrsqrt.f32 %v746_v28  ;;  %v771_v12 = vmul.f32 %v1701_v29, %v2042_v7  ;;  %v796_v35 = vmul.f32 %v2101_v25, %v774_v10  ;;  %v817_v44 = vadd.f32 %v2110_v37, %v795_v36 }
 0x325   :  { %v1703_v32 = vpop.eup %1702  ;;  %v841_v13 = vpack.c.bf16 %v828_v26, %v827_v30 }
 0x326   :  { %v772_v62 = vmul.f32 %v1703_v32, %v2056_v9  ;;  %v793_v33 = vmul.f32 %v2101_v25, %v771_v12  ;;  %v818_v6 = vadd.f32 %v2110_v37, %v796_v35  ;;  %v833_v55 = vmax.f32 %v817_v44, 0.0 }
 0x327   :  { %v1705_v39 = vpop.eup %1704  ;;  %1617 = vmatprep.mubr.bf16.mxu0 %v841_v13 }
 0x328   :  { %v794_v15 = vmul.f32 %v2101_v25, %v772_v62  ;;  %v815_v42 = vadd.f32 %v2110_v37, %v793_v33  ;;  %v769_v7 = vmul.f32 %v1705_v39, %v2051_v19  ;;  %v834_v47 = vmax.f32 %v818_v6, 0.0 }
 0x329   :  { %v1707_v43 = vpop.eup %1706 }
 0x32a   :  { %v816_v46 = vadd.f32 %v2110_v37, %v794_v15  ;;  %v770_v16 = vmul.f32 %v1707_v43, %v2066_v31  ;;  %v791_v49 = vmul.f32 %v2101_v25, %v769_v7  ;;  %v831_v50 = vmax.f32 %v815_v42, 0.0 }
 0x32b   :  { %v1709_v9 = vpop.eup %1708  ;;  %v844_v61 = vpack.c.bf16 %v834_v47, %v833_v55 }
 0x32c   :  { %v832_v51 = vmax.f32 %v816_v46, 0.0  ;;  %v792_v53 = vmul.f32 %v2101_v25, %v770_v16  ;;  %v775_v38 = vmul.f32 %v1709_v9, %v2070_v34  ;;  %v813_v19 = vadd.f32 %v2110_v37, %v791_v49 }
 0x32d   :  { %v1711_v54 = vpop.eup %1710 }
 0x32e   :  { %v843_v56 = vpack.c.bf16 %v832_v51, %v831_v50  ;;  %v814_v57 = vadd.f32 %v2110_v37, %v792_v53  ;;  %v776_v58 = vmul.f32 %v1711_v54, %v2079_v40  ;;  %v797_v31 = vmul.f32 %v2101_v25, %v775_v38 }
 0x32f   :  { %v1713_v59 = vpop.eup %1712  ;;  %v829_v63 = vmax.f32 %v813_v19, 0.0 }
 0x330   :  { %1621 = vmatprep.mubr.bf16.mxu1 %v843_v56  ;;  %v830_v0 = vmax.f32 %v814_v57, 0.0  ;;  %v798_v1 = vmul.f32 %v2101_v25, %v776_v58  ;;  %v819_v34 = vadd.f32 %v2110_v37, %v797_v31  ;;  %v777_v2 = vmul.f32 %v1713_v59, %v2083_v41 }
 0x331   :  { %v1715_v3 = vpop.eup %1714  ;;  %1622 = vmatmul.mubr.bf16.vlgmr.msra.gmra.mxu1 %v844_v61 }
 0x332   :  { %v842_v4 = vpack.c.bf16 %v830_v0, %v829_v63  ;;  %v820_v5 = vadd.f32 %v2110_v37, %v798_v1  ;;  %v778_v40 = vmul.f32 %v1715_v3, %v2092_v45  ;;  %v799_v60 = vmul.f32 %v2101_v25, %v777_v2  ;;  %v1395_v45 = vld [vmem:[%s2372_s7] ss:$0 sm:$0xff] }
 0x333   :  { %v835_v8 = vmax.f32 %v819_v34, 0.0 }
 0x334   :  { %1618 = vmatmul.mubr.bf16.gmra.mxu0 %v842_v4  ;;  %v836_v11 = vmax.f32 %v820_v5, 0.0  ;;  %v800_v14 = vmul.f32 %v2101_v25, %v778_v40  ;;  %v821_v17 = vadd.f32 %v2110_v37, %v799_v60 }
 0x336   :  { %v845_v20 = vpack.c.bf16 %v836_v11, %v835_v8  ;;  %v822_v21 = vadd.f32 %v2110_v37, %v800_v14  ;;  %v837_v41 = vmax.f32 %v821_v17, 0.0 }
 0x338   :  { %1625 = vmatprep.mubr.bf16.mxu1 %v845_v20  ;;  %v838_v48 = vmax.f32 %v822_v21, 0.0 }
 0x33a   :  { %v846_v22 = vpack.c.bf16 %v838_v48, %v837_v41 }
 0x33c   :  { %1626 = vmatmul.mubr.bf16.gmra.mxu1 %v846_v22 }
 0x3df   :  { %v1615_v23 = vpop.f32.mrf.mxu0 }
 0x3e0   :  { %v961_v24 = vadd.f32 %v1615_v23, %v1395_v45 }
 0x3e1   :  { %v952_v27 = vpop.f32.mrf.mxu0 }
 0x3e2   :  { %1021 = vadd.xlane.f32.xlu0 %v961_v24  ;;  %v953_v25 = vadd.f32 %v1395_v45, %v952_v27 }
 0x3e3   :  { %v1616_v52 = vpop.f32.mrf.mxu0 }
 0x3e4   :  { %v964_v10 = vadd.f32 %v1616_v52, %v1395_v45 }
 0x3e5   :  { %v955_v28 = vpop.f32.mrf.mxu0 }
 0x3e6   :  { %1023 = vadd.xlane.f32.xlu1 %v964_v10  ;;  %1017 = vadd.xlane.f32.xlu0 %v953_v25  ;;  %v956_v37 = vadd.f32 %v1395_v45, %v955_v28 }
 0x3ea   :  { %1019 = vadd.xlane.f32.xlu1 %v956_v37 }
 0x3f1   :  { %v1623_v29 = vpop.f32.mrf.mxu1 }
 0x3f2   :  { %v2166_v15 = vadd.f32 %v1623_v29, %v1395_v45 }
 0x3f3   :  { %v984_v30 = vpop.f32.mrf.mxu1 }
 0x3f4   :  { %v1619_v26 = vpop.f32.mrf.mxu0  ;;  %v2172_v43 = vadd.f32 %v1395_v45, %v984_v30 }
 0x3f5   :  { %v2157_v12 = vadd.f32 %v1619_v26, %v1395_v45  ;;  %v1624_v35 = vpop.f32.mrf.mxu1 }
 0x3f6   :  { %v968_v32 = vpop.f32.mrf.mxu0  ;;  %v2174_v44 = vadd.f32 %v1624_v35, %v1395_v45 }
 0x3f7   :  { %1029 = vadd.xlane.f32.xlu0 %v2157_v12  ;;  %v2160_v36 = vadd.f32 %v1395_v45, %v968_v32  ;;  %v987_v33 = vpop.f32.mrf.mxu1 }
 0x3f8   :  { %v1620_v13 = vpop.f32.mrf.mxu0  ;;  %v2178_v16 = vadd.f32 %v1395_v45, %v987_v33 }
 0x3f9   :  { %v2162_v62 = vadd.f32 %v1620_v13, %v1395_v45 }
 0x3fa   :  { %v971_v39 = vpop.f32.mrf.mxu0 }
 0x3fb   :  { %1031 = vadd.xlane.f32.xlu1 %v2162_v62  ;;  %1025 = vadd.xlane.f32.xlu0 %v2160_v36  ;;  %v2168_v42 = vadd.f32 %v1395_v45, %v971_v39 }
 0x3fc   :  { %v1627_v6 = vpop.f32.mrf.mxu1 }
 0x3fd   :  { %v2184_v49 = vadd.f32 %v1627_v6, %v1395_v45 }
 0x3fe   :  { %v1000_v7 = vpop.f32.mrf.mxu1 }
 0x3ff   :  { %1027 = vadd.xlane.f32.xlu1 %v2168_v42  ;;  %1037 = vadd.xlane.f32.xlu0 %v2166_v15  ;;  %v2180_v9 = vadd.f32 %v1395_v45, %v1000_v7 }
 0x400   :  { %v1628_v46 = vpop.f32.mrf.mxu1 }
 0x401   :  { %v2190_v51 = vadd.f32 %v1628_v46, %v1395_v45 }
 0x402   :  { %v1003_v47 = vpop.f32.mrf.mxu1 }
 0x403   :  { %1039 = vadd.xlane.f32.xlu1 %v2174_v44  ;;  %1033 = vadd.xlane.f32.xlu0 %v2172_v43  ;;  %v2186_v50 = vadd.f32 %v1395_v45, %v1003_v47 }
 0x407   :  { %1035 = vadd.xlane.f32.xlu1 %v2178_v16  ;;  %1041 = vadd.xlane.f32.xlu0 %v2180_v9 }
 0x40b   :  { %1043 = vadd.xlane.f32.xlu1 %v2186_v50  ;;  %1045 = vadd.xlane.f32.xlu0 %v2184_v49 }
 0x40f   :  { %1047 = vadd.xlane.f32.xlu1 %v2190_v51 }
 0x46b   :  { %v1022_v53 = vpop.xlane.xlu0 %1021 }
 0x46c   :  { %v1051_v38 = vmul.f32 0.03125, %v1022_v53 }
 0x46e   :  { %v1067_v54 = vsub.f32 %v961_v24, %v1051_v38 }
 0x46f   :  { %v1024_v55 = vpop.xlane.xlu1 %1023  ;;  %v1018_v19 = vpop.xlane.xlu0 %1017 }
 0x470   :  { %v1052_v56 = vmul.f32 0.03125, %v1024_v55  ;;  %v1049_v57 = vmul.f32 0.03125, %v1018_v19  ;;  %v2195_v58 = vsel %vm584_vm0, %v1067_v54, 0.0 }
 0x471   :  { %v1099_v31 = vmul.f32 %v2195_v58, %v2195_v58 }
 0x472   :  { %v1068_v59 = vsub.f32 %v964_v10, %v1052_v56  ;;  %v1065_v61 = vsub.f32 %v953_v25, %v1049_v57 }
 0x473   :  { %v1020_v63 = vpop.xlane.xlu1 %1019  ;;  %1117 = vadd.xlane.f32.xlu0 %v1099_v31 }
 0x474   :  { %v1050_v0 = vmul.f32 0.03125, %v1020_v63  ;;  %v2201_v1 = vsel %vm584_vm0, %v1068_v59, 0.0  ;;  %v2205_v34 = vsel %vm584_vm0, %v1065_v61, 0.0 }
 0x475   :  { %v1100_v2 = vmul.f32 %v2201_v1, %v2201_v1  ;;  %v1097_v3 = vmul.f32 %v2205_v34, %v2205_v34 }
 0x476   :  { %v1066_v4 = vsub.f32 %v956_v37, %v1050_v0 }
 0x477   :  { %1119 = vadd.xlane.f32.xlu1 %v1100_v2  ;;  %1113 = vadd.xlane.f32.xlu0 %v1097_v3 }
 0x478   :  { %v2213_v5 = vsel %vm584_vm0, %v1066_v4, 0.0 }
 0x479   :  { %v1098_v40 = vmul.f32 %v2213_v5, %v2213_v5 }
 0x47b   :  { %1115 = vadd.xlane.f32.xlu1 %v1098_v40 }
 0x480   :  { %v1030_v60 = vpop.xlane.xlu0 %1029 }
 0x481   :  { %v1055_v8 = vmul.f32 0.03125, %v1030_v60 }
 0x483   :  { %v1071_v11 = vsub.f32 %v2157_v12, %v1055_v8 }
 0x484   :  { %v1032_v14 = vpop.xlane.xlu1 %1031  ;;  %v1026_v17 = vpop.xlane.xlu0 %1025 }
 0x485   :  { %v1056_v20 = vmul.f32 0.03125, %v1032_v14  ;;  %v1053_v21 = vmul.f32 0.03125, %v1026_v17  ;;  %v2220_v41 = vsel %vm584_vm0, %v1071_v11, 0.0 }
 0x486   :  { %v1103_v48 = vmul.f32 %v2220_v41, %v2220_v41 }
 0x487   :  { %v1072_v22 = vsub.f32 %v2162_v62, %v1056_v20  ;;  %v1069_v45 = vsub.f32 %v2160_v36, %v1053_v21 }
 0x488   :  { %v1028_v23 = vpop.xlane.xlu1 %1027  ;;  %1125 = vadd.xlane.f32.xlu0 %v1103_v48  ;;  %v1038_v24 = vpop.xlane.xlu0 %1037 }
 0x489   :  { %v1054_v27 = vmul.f32 0.03125, %v1028_v23  ;;  %v1059_v52 = vmul.f32 0.03125, %v1038_v24  ;;  %v2228_v25 = vsel %vm584_vm0, %v1072_v22, 0.0  ;;  %v2232_v10 = vsel %vm584_vm0, %v1069_v45, 0.0 }
 0x48a   :  { %v1104_v28 = vmul.f32 %v2228_v25, %v2228_v25  ;;  %v1101_v37 = vmul.f32 %v2232_v10, %v2232_v10 }
 0x48b   :  { %v1070_v29 = vsub.f32 %v2168_v42, %v1054_v27  ;;  %v1075_v30 = vsub.f32 %v2166_v15, %v1059_v52  ;;  %v2304_v52 = vld [vmem:[%s2373_s8] ss:$0 sm:$0xff]  ;;  %s1862_s8 = smov [#allocation11]  }
 0x48c   :  { %v1040_v26 = vpop.xlane.xlu1 %1039  ;;  %1127 = vadd.xlane.f32.xlu1 %v1104_v28  ;;  %1121 = vadd.xlane.f32.xlu0 %v1101_v37  ;;  %v1034_v12 = vpop.xlane.xlu0 %1033 }
 0x48d   :  { %v1060_v35 = vmul.f32 0.03125, %v1040_v26  ;;  %v1057_v32 = vmul.f32 0.03125, %v1034_v12  ;;  %v2242_v13 = vsel %vm584_vm0, %v1070_v29, 0.0  ;;  %v2246_v36 = vsel %vm584_vm0, %v1075_v30, 0.0  ;;  %v2311_v26 = vld [vmem:[%s2374_s9] ss:$0 sm:$0xff] }
 0x48e   :  { %v1102_v62 = vmul.f32 %v2242_v13, %v2242_v13  ;;  %v1107_v33 = vmul.f32 %v2246_v36, %v2246_v36  ;;  %s1354_s9 = sshll.u32 %s1862_s8, 4  ;;  %s1355_s9 = int_to_ptr.vmem [resolvable:$true] %s1354_s9 }
 0x48f   :  { %v1076_v39 = vsub.f32 %v2174_v44, %v1060_v35  ;;  %v1073_v6 = vsub.f32 %v2172_v43, %v1057_v32  ;;  %s1828_s21 = scalar_lea.vmem %s1355_s9, 1024  ;;  %p1833_p7 = scmp.lt.s32.totalorder %s1355_s9, %s1355_s9 }
 0x490   :  { %v1036_v15 = vpop.xlane.xlu1 %1035  ;;  %1123 = vadd.xlane.f32.xlu1 %v1102_v62  ;;  %1133 = vadd.xlane.f32.xlu0 %v1107_v33  ;;  %v1042_v42 = vpop.xlane.xlu0 %1041  ;;  %p1829_p6 = scmp.ne.s32.totalorder %s1355_s9, %s1828_s21  ;;  %p1834_p8 = scmp.lt.s32.totalorder %s1828_s21, %s1828_s21 }
 0x491   :  { %v1058_v7 = vmul.f32 0.03125, %v1036_v15  ;;  %v1061_v46 = vmul.f32 0.03125, %v1042_v42  ;;  %v2256_v47 = vsel %vm584_vm0, %v1076_v39, 0.0  ;;  %v2260_v53 = vsel %vm584_vm0, %v1073_v6, 0.0 }
 0x492   :  { %v1108_v38 = vmul.f32 %v2256_v47, %v2256_v47  ;;  %v1105_v43 = vmul.f32 %v2260_v53, %v2260_v53  ;;  %p1835_p9 = por %p1834_p8, %p1833_p7 }
 0x493   :  { %v1074_v44 = vsub.f32 %v2178_v16, %v1058_v7  ;;  %v1077_v54 = vsub.f32 %v2180_v9, %v1061_v46 }
 0x494   :  { %1135 = vadd.xlane.f32.xlu1 %v1108_v38  ;;  %v1044_v55 = vpop.xlane.xlu1 %1043  ;;  %1129 = vadd.xlane.f32.xlu0 %v1105_v43  ;;  %v1046_v19 = vpop.xlane.xlu0 %1045  ;;  %p1836_p10 = pnand %p1835_p9, %p1829_p6 }
 0x495   :  { %v1062_v56 = vmul.f32 0.03125, %v1044_v55  ;;  %v1063_v57 = vmul.f32 0.03125, %v1046_v19  ;;  %v2270_v31 = vsel %vm584_vm0, %v1074_v44, 0.0  ;;  %v2274_v59 = vsel %vm584_vm0, %v1077_v54, 0.0 }
 0x496   :  { %v1106_v61 = vmul.f32 %v2270_v31, %v2270_v31  ;;  %v1109_v16 = vmul.f32 %v2274_v59, %v2274_v59 }
 0x497   :  { %v1078_v9 = vsub.f32 %v2186_v50, %v1062_v56  ;;  %v1079_v63 = vsub.f32 %v2184_v49, %v1063_v57 }
 0x498   :  { %1131 = vadd.xlane.f32.xlu1 %v1106_v61  ;;  %v1048_v0 = vpop.xlane.xlu1 %1047  ;;  %1137 = vadd.xlane.f32.xlu0 %v1109_v16 }
 0x499   :  { %v1064_v2 = vmul.f32 0.03125, %v1048_v0  ;;  %v2284_v3 = vsel %vm584_vm0, %v1078_v9, 0.0  ;;  %v2288_v4 = vsel %vm584_vm0, %v1079_v63, 0.0 }
 0x49a   :  { %v1110_v40 = vmul.f32 %v2284_v3, %v2284_v3  ;;  %v1111_v50 = vmul.f32 %v2288_v4, %v2288_v4 }
 0x49b   :  { %v1080_v49 = vsub.f32 %v2190_v51, %v1064_v2 }
 0x49c   :  { %1139 = vadd.xlane.f32.xlu1 %v1110_v40  ;;  %1141 = vadd.xlane.f32.xlu0 %v1111_v50 }
 0x49d   :  { %v2297_v60 = vsel %vm584_vm0, %v1080_v49, 0.0 }
 0x49e   :  { %v1112_v8 = vmul.f32 %v2297_v60, %v2297_v60 }
 0x4a0   :  { %1143 = vadd.xlane.f32.xlu1 %v1112_v8 }
 0x4fc   :  { %v1118_v11 = vpop.xlane.xlu0 %1117 }
 0x4fd   :  { %v1147_v14 = vmul.f32 0.03125, %v1118_v11 }
 0x4ff   :  { %v1163_v17 = vadd.f32 1e-05, %v1147_v14 }
 0x500   :  { %v1120_v20 = vpop.xlane.xlu1 %1119  ;;  %v1114_v21 = vpop.xlane.xlu0 %1113 }
 0x501   :  { %1716 = vrsqrt.f32 %v1163_v17  ;;  %v1148_v48 = vmul.f32 0.03125, %v1120_v20  ;;  %v1145_v22 = vmul.f32 0.03125, %v1114_v21 }
 0x503   :  { %v1164_v45 = vadd.f32 1e-05, %v1148_v48  ;;  %v1161_v51 = vadd.f32 1e-05, %v1145_v22 }
 0x504   :  { %v1116_v23 = vpop.xlane.xlu1 %1115 }
 0x505   :  { %1718 = vrsqrt.f32 %v1164_v45  ;;  %v1146_v24 = vmul.f32 0.03125, %v1116_v23 }
 0x506   :  { %1720 = vrsqrt.f32 %v1161_v51 }
 0x507   :  { %v1162_v18 = vadd.f32 1e-05, %v1146_v24 }
 0x509   :  { %1722 = vrsqrt.f32 %v1162_v18 }
 0x50e   :  { %v1717_v27 = vpop.eup %1716 }
 0x50f   :  { %v1195_v28 = vmul.f32 %v1717_v27, %v2195_v58 }
 0x511   :  { %v1217_v37 = vmul.f32 %v2304_v52, %v1195_v28  ;;  %v1126_v29 = vpop.xlane.xlu0 %1125 }
 0x512   :  { %v1719_v30 = vpop.eup %1718  ;;  %v1151_v12 = vmul.f32 0.03125, %v1126_v29 }
 0x513   :  { %v1721_v35 = vpop.eup %1720  ;;  %v1196_v32 = vmul.f32 %v1719_v30, %v2201_v1  ;;  %v1239_v39 = vadd.f32 %v2311_v26, %v1217_v37 }
 0x514   :  { %v1193_v62 = vmul.f32 %v1721_v35, %v2205_v34  ;;  %v1167_v33 = vadd.f32 1e-05, %v1151_v12 }
 0x515   :  { %v1218_v58 = vmul.f32 %v2304_v52, %v1196_v32  ;;  %v1128_v6 = vpop.xlane.xlu1 %1127  ;;  %v1122_v15 = vpop.xlane.xlu0 %1121  ;;  %v1255_v34 = vmax.f32 %v1239_v39, 0.0 }
 0x516   :  { %v1723_v42 = vpop.eup %1722  ;;  %v1215_v7 = vmul.f32 %v2304_v52, %v1193_v62  ;;  %1724 = vrsqrt.f32 %v1167_v33  ;;  %v1152_v46 = vmul.f32 0.03125, %v1128_v6  ;;  %v1149_v38 = vmul.f32 0.03125, %v1122_v15 }
 0x517   :  { %v1240_v43 = vadd.f32 %v2311_v26, %v1218_v58  ;;  %v1194_v44 = vmul.f32 %v1723_v42, %v2213_v5 }
 0x518   :  { %v1168_v1 = vadd.f32 1e-05, %v1152_v46  ;;  %v1165_v54 = vadd.f32 1e-05, %v1149_v38  ;;  %v1237_v19 = vadd.f32 %v2311_v26, %v1215_v7 }
 0x519   :  { %v1256_v55 = vmax.f32 %v1240_v43, 0.0  ;;  %v1216_v56 = vmul.f32 %v2304_v52, %v1194_v44  ;;  %v1124_v57 = vpop.xlane.xlu1 %1123  ;;  %v1134_v61 = vpop.xlane.xlu0 %1133 }
 0x51a   :  { %1726 = vrsqrt.f32 %v1168_v1  ;;  %v1150_v16 = vmul.f32 0.03125, %v1124_v57  ;;  %v1155_v9 = vmul.f32 0.03125, %v1134_v61  ;;  %v1253_v5 = vmax.f32 %v1237_v19, 0.0 }
 0x51b   :  { %v1446_v63 = vpack.c.bf16 %v1256_v55, %v1255_v34  ;;  %v1238_v0 = vadd.f32 %v2311_v26, %v1216_v56  ;;  %1728 = vrsqrt.f32 %v1165_v54 }
 0x51c   :  { %v1166_v2 = vadd.f32 1e-05, %v1150_v16  ;;  %v1171_v40 = vadd.f32 1e-05, %v1155_v9 }
 0x51d   :  { %1478 = vst [vmem:[#allocation11 + $0x8] sm:$0xff] %v1446_v63   ;;  %v1254_v50 = vmax.f32 %v1238_v0, 0.0  ;;  %v1136_v49 = vpop.xlane.xlu1 %1135  ;;  %v1130_v8 = vpop.xlane.xlu0 %1129 }
 0x51e   :  { %1730 = vrsqrt.f32 %v1166_v2  ;;  %v1156_v11 = vmul.f32 0.03125, %v1136_v49  ;;  %v1153_v14 = vmul.f32 0.03125, %v1130_v8 }
 0x51f   :  { %v1441_v17 = vpack.c.bf16 %v1254_v50, %v1253_v5  ;;  %1732 = vrsqrt.f32 %v1171_v40 }
 0x520   :  { %v1172_v20 = vadd.f32 1e-05, %v1156_v11  ;;  %v1169_v21 = vadd.f32 1e-05, %v1153_v14 }
 0x521   :  { %1442 = vst [vmem:[#allocation11] sm:$0xff] %v1441_v17   ;;  %v1132_v48 = vpop.xlane.xlu1 %1131  ;;  %v1138_v22 = vpop.xlane.xlu0 %1137 }
 0x522   :  { %1734 = vrsqrt.f32 %v1172_v20  ;;  %v1154_v45 = vmul.f32 0.03125, %v1132_v48  ;;  %v1157_v51 = vmul.f32 0.03125, %v1138_v22 }
 0x523   :  { %v1725_v23 = vpop.eup %1724  ;;  %1736 = vrsqrt.f32 %v1169_v21 }
 0x524   :  { %v1199_v24 = vmul.f32 %v1725_v23, %v2220_v41  ;;  %v1170_v18 = vadd.f32 1e-05, %v1154_v45  ;;  %v1173_v27 = vadd.f32 1e-05, %v1157_v51 }
 0x525   :  { %v1140_v28 = vpop.xlane.xlu1 %1139  ;;  %v1142_v37 = vpop.xlane.xlu0 %1141 }
 0x526   :  { %v1221_v29 = vmul.f32 %v2304_v52, %v1199_v24  ;;  %1738 = vrsqrt.f32 %v1170_v18  ;;  %v1158_v30 = vmul.f32 0.03125, %v1140_v28  ;;  %v1159_v12 = vmul.f32 0.03125, %v1142_v37 }
 0x527   :  { %v1727_v35 = vpop.eup %1726  ;;  %1740 = vrsqrt.f32 %v1173_v27 }
 0x528   :  { %v1729_v32 = vpop.eup %1728  ;;  %v1200_v62 = vmul.f32 %v1727_v35, %v2228_v25  ;;  %v1174_v33 = vadd.f32 1e-05, %v1158_v30  ;;  %v1175_v39 = vadd.f32 1e-05, %v1159_v12  ;;  %v1243_v58 = vadd.f32 %v2311_v26, %v1221_v29 }
 0x529   :  { %v1197_v41 = vmul.f32 %v1729_v32, %v2232_v10  ;;  %v1144_v6 = vpop.xlane.xlu1 %1143 }
 0x52a   :  { %v1222_v15 = vmul.f32 %v2304_v52, %v1200_v62  ;;  %1742 = vrsqrt.f32 %v1174_v33  ;;  %v1160_v42 = vmul.f32 0.03125, %v1144_v6  ;;  %v1259_v1 = vmax.f32 %v1243_v58, 0.0 }
 0x52b   :  { %v1731_v7 = vpop.eup %1730  ;;  %v1219_v46 = vmul.f32 %v2304_v52, %v1197_v41  ;;  %1744 = vrsqrt.f32 %v1175_v39 }
 0x52c   :  { %v1733_v38 = vpop.eup %1732  ;;  %v1244_v43 = vadd.f32 %v2311_v26, %v1222_v15  ;;  %v1198_v25 = vmul.f32 %v1731_v7, %v2242_v13  ;;  %v1176_v44 = vadd.f32 1e-05, %v1160_v42 }
 0x52d   :  { %v1203_v54 = vmul.f32 %v1733_v38, %v2246_v36  ;;  %v1241_v10 = vadd.f32 %v2311_v26, %v1219_v46 }
 0x52e   :  { %v1260_v34 = vmax.f32 %v1244_v43, 0.0  ;;  %v1220_v55 = vmul.f32 %v2304_v52, %v1198_v25  ;;  %1746 = vrsqrt.f32 %v1176_v44 }
 0x52f   :  { %v1735_v19 = vpop.eup %1734  ;;  %v1225_v56 = vmul.f32 %v2304_v52, %v1203_v54  ;;  %v1257_v63 = vmax.f32 %v1241_v10, 0.0 }
 0x530   :  { %v1737_v57 = vpop.eup %1736  ;;  %v1456_v61 = vpack.c.bf16 %v1260_v34, %v1259_v1  ;;  %v1242_v16 = vadd.f32 %v2311_v26, %v1220_v55  ;;  %v1204_v9 = vmul.f32 %v1735_v19, %v2256_v47 }
 0x531   :  { %v1201_v13 = vmul.f32 %v1737_v57, %v2260_v53  ;;  %v1247_v0 = vadd.f32 %v2311_v26, %v1225_v56 }
 0x532   :  { %1480 = vst [vmem:[#allocation11 + $0x18] sm:$0xff] %v1456_v61   ;;  %v1258_v36 = vmax.f32 %v1242_v16, 0.0  ;;  %v1226_v2 = vmul.f32 %v2304_v52, %v1204_v9 }
 0x533   :  { %v1739_v40 = vpop.eup %1738  ;;  %v1223_v5 = vmul.f32 %v2304_v52, %v1201_v13  ;;  %v1263_v53 = vmax.f32 %v1247_v0, 0.0 }
 0x534   :  { %v1741_v50 = vpop.eup %1740  ;;  %v1451_v49 = vpack.c.bf16 %v1258_v36, %v1257_v63  ;;  %v1248_v8 = vadd.f32 %v2311_v26, %v1226_v2  ;;  %v1202_v11 = vmul.f32 %v1739_v40, %v2270_v31 }
 0x535   :  { %v1205_v47 = vmul.f32 %v1741_v50, %v2274_v59  ;;  %v1245_v17 = vadd.f32 %v2311_v26, %v1223_v5 }
 0x536   :  { %1479 = vst [vmem:[#allocation11 + $0x10] sm:$0xff] %v1451_v49   ;;  %v1264_v14 = vmax.f32 %v1248_v8, 0.0  ;;  %v1224_v20 = vmul.f32 %v2304_v52, %v1202_v11 }
 0x537   :  { %v1743_v21 = vpop.eup %1742  ;;  %v1227_v48 = vmul.f32 %v2304_v52, %v1205_v47  ;;  %v1261_v59 = vmax.f32 %v1245_v17, 0.0 }
 0x538   :  { %v1745_v22 = vpop.eup %1744  ;;  %v1466_v45 = vpack.c.bf16 %v1264_v14, %v1263_v53  ;;  %v1246_v51 = vadd.f32 %v2311_v26, %v1224_v20  ;;  %v1206_v23 = vmul.f32 %v1743_v21, %v2284_v3 }
 0x539   :  { %v1207_v31 = vmul.f32 %v1745_v22, %v2288_v4  ;;  %v1249_v18 = vadd.f32 %v2311_v26, %v1227_v48 }
 0x53a   :  { %1482 = vst [vmem:[#allocation11 + $0x28] sm:$0xff] %v1466_v45   ;;  %v1262_v24 = vmax.f32 %v1246_v51, 0.0  ;;  %v1228_v27 = vmul.f32 %v2304_v52, %v1206_v23 }
 0x53b   :  { %v1747_v28 = vpop.eup %1746  ;;  %v1229_v37 = vmul.f32 %v2304_v52, %v1207_v31  ;;  %v1265_v35 = vmax.f32 %v1249_v18, 0.0 }
 0x53c   :  { %v1461_v29 = vpack.c.bf16 %v1262_v24, %v1261_v59  ;;  %v1250_v30 = vadd.f32 %v2311_v26, %v1228_v27  ;;  %v1208_v12 = vmul.f32 %v1747_v28, %v2297_v60 }
 0x53d   :  { %v1251_v4 = vadd.f32 %v2311_v26, %v1229_v37 }
 0x53e   :  { %1481 = vst [vmem:[#allocation11 + $0x20] sm:$0xff] %v1461_v29   ;;  %v1266_v3 = vmax.f32 %v1250_v30, 0.0  ;;  %v1230_v32 = vmul.f32 %v2304_v52, %v1208_v12 }
 0x53f   :  { %v1267_v39 = vmax.f32 %v1251_v4, 0.0 }
 0x540   :  { %v1471_v62 = vpack.c.bf16 %v1266_v3, %v1265_v35  ;;  %v1252_v33 = vadd.f32 %v2311_v26, %v1230_v32 }
 0x542   :  { %1483 = vst [vmem:[#allocation11 + $0x30] sm:$0xff] %v1471_v62   ;;  %v1268_v58 = vmax.f32 %v1252_v33, 0.0 }
 0x544   :  { %v1476_v41 = vpack.c.bf16 %v1268_v58, %v1267_v39 }
 0x546   :  { %1484 = vst [vmem:[#allocation11 + $0x38] sm:$0xff] %v1476_v41  }
 0x547   :  { %1839 = shalt.err (!%p1836_p10)
}
 0x548   :  { %1360 = dma.vmem_to_hbm [thread:$0]  %s1355_s9, 1024, %s2375_s10, [#allocation5], %s1858_s18, %s1858_s18, %s1859_s19  }
 0x549   :  { %1854 = dma.done.wait [#allocation5], 1024  }
 0x54a   :  { %1855 = vsyncadd [#allocation5], 4294966272 }
 0x54b   :  { %1364 = vsyncpa [#allocation4], 1 }
 0x54c   :  { %1365 = vsyncpa [#allocation7], 1 }
 0x54d   :  { %1366 = vsyncpa [#allocation10], 1 }
 0x54e   :  { %1367 = vsyncpa [#allocation5], 1 }

</bundles_post_ra>
